<compile_context>
chip_gen: v6e
topology: v6e:2x2x1
jax: 0.10.0
libtpu: 0.0.40
codegen_flags: <defaults>
</compile_context>

<pallas_src>
import jax
import jax.numpy as jnp
from jax.experimental import pallas as pl
from jax.experimental.pallas import tpu as pltpu

H = W = 8
HW = H * W                   # 64
CONV_OUT = 2
FLAT = CONV_OUT * HW         # 128
N_MOVES = 4672
TB_MAX = 512                 # max batch-tile rows per grid step
FOLD_K_MAX = 512             # fold the 1x1 conv into the FC when C*64 <= this


def _round_up(x, m):
    return ((x + m - 1) // m) * m


def _cdiv(a, b):
    return -(-a // b)


def _pick_batch_tile(b):
    """Batch-tile rows: multiple of 16, <= TB_MAX, and >=2 grid steps when
    possible so both v7x TensorCores get work (harmless on v5e/v6e)."""
    b16 = _round_up(max(b, 1), 16)
    if b16 <= 16:
        return 16
    n_tiles = max(2, _cdiv(b16, TB_MAX))
    return _round_up(_cdiv(b16, n_tiles), 16)


def policy_fc_kernel(x_ref, w_ref, b_ref, o_ref):
    # x_ref: (TB, K)        bf16 activations
    # w_ref: (K, 4672)      bf16 (conv-folded) fc weight, transposed
    # b_ref: (1, 4672)      f32  (conv-folded) fc bias
    # o_ref: (TB, 4672)     f32 (or bf16) logits
    acc = jnp.dot(x_ref[...], w_ref[...], preferred_element_type=jnp.float32)
    o_ref[...] = (acc + b_ref[...]).astype(o_ref.dtype)


def prepare_policy_head_params(conv_w, conv_b, fc_w, fc_b):
    """One-time parameter prep (hoisted out of the per-call path).

    Returns (w_kernel_bf16, bias_row_f32, conv_w2, conv_b) where conv_w2 is
    None when the 1x1 conv has been folded into the FC weight.
    """
    C = conv_w.shape[1]
    conv_w2 = conv_w.reshape(CONV_OUT, C).astype(jnp.float32)
    fc_w3 = fc_w.reshape(N_MOVES, CONV_OUT, HW).astype(jnp.float32)

    if C * HW <= FOLD_K_MAX:
        # Fold conv into FC: W_fold[c*64+s, n] = sum_o fc_w[n,o*64+s]*conv_w[o,c]
        w_fold = jnp.einsum("nos,oc->csn", fc_w3, conv_w2).reshape(C * HW, N_MOVES)
        b_fold = fc_b.astype(jnp.float32) + jnp.einsum(
            "nos,o->n", fc_w3, conv_b.astype(jnp.float32))
        return (w_fold.astype(jnp.bfloat16),
                b_fold.reshape(1, N_MOVES).astype(jnp.float32),
                None, None)

    # Large C: keep a separate (cheap) XLA 1x1-conv prologue, kernel K = 128.
    return (fc_w.T.astype(jnp.bfloat16),
            fc_b.reshape(1, N_MOVES).astype(jnp.float32),
            conv_w2, conv_b.astype(jnp.float32))


def policy_head_apply(x, w_kernel, bias_row, conv_w2=None, conv_b=None,
                      out_dtype=jnp.float32):
    """x: (B, C, 8, 8) f32; returns (B, 4672) logits in out_dtype."""
    B, C = x.shape[0], x.shape[1]
    assert (x.shape[2], x.shape[3]) == (H, W)
    K = w_kernel.shape[0]

    if conv_w2 is None:
        # Conv already folded into w_kernel: activations are just the raw
        # NCHW board flattened channel-major (c*64 + h*8 + w).
        act = x.reshape(B, K)
    else:
        # Fallback prologue for large C: tiny 1x1 conv + PyTorch-order flatten.
        y = jnp.einsum("bcs,oc->bos", x.reshape(B, C, HW), conv_w2)
        y = y + conv_b.reshape(1, CONV_OUT, 1)
        act = y.reshape(B, FLAT)
    act = act.astype(jnp.bfloat16)

    tb = _pick_batch_tile(B)
    b_pad = _round_up(B, tb)
    if b_pad != B:
        act = jnp.pad(act, ((0, b_pad - B), (0, 0)))

    out_itemsize = jnp.dtype(out_dtype).itemsize
    cost = pl.CostEstimate(
        flops=2 * b_pad * K * N_MOVES,
        transcendentals=0,
        bytes_accessed=(b_pad * K * 2 + K * N_MOVES * 2
                        + N_MOVES * 4 + b_pad * N_MOVES * out_itemsize),
    )

    out = pl.pallas_call(
        policy_fc_kernel,
        out_shape=jax.ShapeDtypeStruct((b_pad, N_MOVES), out_dtype),
        grid_spec=pltpu.PrefetchScalarGridSpec(
            num_scalar_prefetch=0,
            grid=(b_pad // tb,),
            in_specs=[
                pl.BlockSpec((tb, K), lambda i: (i, 0)),
                # Grid-invariant index maps: Mosaic keeps weight/bias resident
                # across grid steps (no per-step re-DMA).
                pl.BlockSpec((K, N_MOVES), lambda i: (0, 0)),
                pl.BlockSpec((1, N_MOVES), lambda i: (0, 0)),
            ],
            # Full-width output block (block last dim == array dim) -> no
            # post-kernel column slice; only the last 64-lane tail is masked.
            out_specs=pl.BlockSpec((tb, N_MOVES), lambda i: (i, 0)),
        ),
        compiler_params=pltpu.CompilerParams(
            dimension_semantics=("parallel",),
            vmem_limit_bytes=32 * 1024 * 1024,
        ),
        cost_estimate=cost,
    )(act, w_kernel, bias_row)

    # Strip batch padding only (cheap contiguous row slice, no-op if b_pad==B).
    return out[:B]


def _reference(x_nchw, conv_w, conv_b, fc_w, fc_b):
    # Pure-JAX f32 reference matching the PyTorch semantics.
    B, C, _, _ = x_nchw.shape
    y = jnp.einsum("bchw,oc->bohw", x_nchw, conv_w.reshape(CONV_OUT, C))
    y = y + conv_b.reshape(1, CONV_OUT, 1, 1)
    flat = y.reshape(B, FLAT)
    return flat @ fc_w.T + fc_b


if __name__ == "__main__":
    B, C = 2, 4  # small channels; spatial fixed at 8x8 by the fc (2*8*8 = 128)

    key = jax.random.PRNGKey(0)
    kx, kcw, kcb, kfw, kfb = jax.random.split(key, 5)

    x = jax.random.normal(kx, (B, C, H, W), dtype=jnp.float32)
    # Deterministic synthetic parameters (shapes from nn.Conv2d / nn.Linear).
    conv_w = jax.random.normal(kcw, (CONV_OUT, C, 1, 1), dtype=jnp.float32) * 0.1
    conv_b = jax.random.normal(kcb, (CONV_OUT,), dtype=jnp.float32) * 0.1
    fc_w = jax.random.normal(kfw, (N_MOVES, FLAT), dtype=jnp.float32) * 0.05
    fc_b = jax.random.normal(kfb, (N_MOVES,), dtype=jnp.float32) * 0.05

    # One-time parameter prep (conv fold + transpose + bf16 cast), hoisted out
    # of the per-call path.
    w_k, b_k, cw2, cb1 = prepare_policy_head_params(conv_w, conv_b, fc_w, fc_b)

    fwd = jax.jit(policy_head_apply)
    if cw2 is None:
        out = fwd(x, w_k, b_k)
    else:
        out = fwd(x, w_k, b_k, cw2, cb1)
    out = jax.block_until_ready(out)

    ref = _reference(x, conv_w, conv_b, fc_w, fc_b)
    assert out.shape == (B, N_MOVES)
    assert out.dtype == jnp.float32
    # bf16 inputs / f32 MXU accumulation -> loosened tolerance vs f32 reference.
    assert jnp.allclose(out, ref, atol=1e-2, rtol=5e-2), "mismatch vs reference"

    print("KERNEL_OK")
</pallas_src>

<mosaic_0001>
module attributes {stable_mosaic.version = 11 : i64} {
  func.func @policy_fc_kernel(%arg0: i32, %arg1: memref<16x256xbf16, #tpu.memory_space<vmem>>, %arg2: memref<256x4672xbf16, #tpu.memory_space<vmem>>, %arg3: memref<1x4672xf32, #tpu.memory_space<vmem>>, %arg4: memref<16x4672xf32, #tpu.memory_space<vmem>>) attributes {dimension_semantics = [#tpu.dimension_semantics<parallel>], iteration_bounds = array<i64: 1>, scalar_prefetch = 0 : i64, scratch_operands = 0 : i64, tpu.core_type = #tpu.core_type<tc>, window_params = [{transform_indices = @transform_0, window_bounds = array<i64: 16, 256>}, {pipeline_mode = #tpu.pipeline_mode<synchronous>, transform_indices = @transform_1, window_bounds = array<i64: 256, 4672>}, {pipeline_mode = #tpu.pipeline_mode<synchronous>, transform_indices = @transform_2, window_bounds = array<i64: 1, 4672>}, {transform_indices = @transform_3, window_bounds = array<i64: 16, 4672>}]} {
    %c0 = arith.constant 0 : index
    %c0_0 = arith.constant 0 : index
    %0 = vector.load %arg1[%c0, %c0_0] : memref<16x256xbf16, #tpu.memory_space<vmem>>, vector<16x256xbf16>
    %c0_1 = arith.constant 0 : index
    %c0_2 = arith.constant 0 : index
    %1 = vector.load %arg2[%c0_1, %c0_2] : memref<256x4672xbf16, #tpu.memory_space<vmem>>, vector<256x4672xbf16>
    %cst = arith.constant dense<0.000000e+00> : vector<16x4672xf32>
    %2 = tpu.matmul %0, %1, %cst {dimension_numbers = #tpu.dot_dimension_numbers<[1], [0], [0], [1], [0, 0, 1, 1], [], []>} : vector<16x256xbf16>, vector<256x4672xbf16>, vector<16x4672xf32> -> vector<16x4672xf32>
    %c0_3 = arith.constant 0 : index
    %c0_4 = arith.constant 0 : index
    %3 = vector.load %arg3[%c0_3, %c0_4] : memref<1x4672xf32, #tpu.memory_space<vmem>>, vector<1x4672xf32>
    %4 = vector.broadcast %3 : vector<1x4672xf32> to vector<16x4672xf32>
    %5 = arith.addf %2, %4 : vector<16x4672xf32>
    %c0_5 = arith.constant 0 : index
    %c0_6 = arith.constant 0 : index
    %6 = vector.load %arg4[%c0_5, %c0_6] : memref<16x4672xf32, #tpu.memory_space<vmem>>, vector<16x4672xf32>
    tpu.vector_store %arg4[%c0_5, %c0_6], %5 {strides = array<i32>} : memref<16x4672xf32, #tpu.memory_space<vmem>>, vector<16x4672xf32>,
    return
  }
  func.func @transform_0(%arg0: i32) -> (i32, i32) {
    %c0_i32 = arith.constant 0 : i32
    %c0_i32_0 = arith.constant 0 : i32
    return %arg0, %c0_i32 : i32, i32
  }
  func.func @transform_1(%arg0: i32) -> (i32, i32) {
    %c0_i32 = arith.constant 0 : i32
    %c0_i32_0 = arith.constant 0 : i32
    %c0_i32_1 = arith.constant 0 : i32
    return %c0_i32, %c0_i32_0 : i32, i32
  }
  func.func @transform_2(%arg0: i32) -> (i32, i32) {
    %c0_i32 = arith.constant 0 : i32
    %c0_i32_0 = arith.constant 0 : i32
    %c0_i32_1 = arith.constant 0 : i32
    return %c0_i32, %c0_i32_0 : i32, i32
  }
  func.func @transform_3(%arg0: i32) -> (i32, i32) {
    %c0_i32 = arith.constant 0 : i32
    %c0_i32_0 = arith.constant 0 : i32
    return %arg0, %c0_i32 : i32, i32
  }
}

</mosaic_0001>

<bundles_post_ra>
// kernel: policy_head_apply.1
= control target key start
LH: loop header
LB: loop body
LE: loop exit
PB: predicated region body
PF: predicated region fallthrough
CT: control target
= control target key end

     0   :  { %vm4657_vm0 = vcmask 523264   ;;  %s8409_s1 = inlined_call_operand.vmem [shape: bf16[256,4672], index: 1, kind: input, shape index: {}]   ;;  %s8410_s0 = inlined_call_operand.vmem [shape: bf16[16,256], index: 0, kind: input, shape index: {}]   ;;  %s8411_s2 = inlined_call_operand.vmem [shape: f32[1,4672], index: 2, kind: input, shape index: {}]   ;;  %s8412_s3 = inlined_call_operand.vmem [shape: f32[16,4672], index: 3, kind: output, shape index: {}]  }
   0x1   :  { %v5316_v0 = vld [vmem:[%s8409_s1 + $0x81c] ss:$148 sps:$4 sm:$0xff]   ;;  %v5318_v1 = vld [vmem:[%s8409_s1 + $0x818] ss:$148 sps:$4 sm:$0xff]   ;;  %v5319_v2 = vld [vmem:[%s8409_s1 + $0x6f4] ss:$148 sps:$4 sm:$0xff]  }
   0x2   :  { %3806 = vmatprep.subr.bf16.mxu0 %v5316_v0  ;;  %v5321_v3 = vld [vmem:[%s8409_s1 + $0x6f0] ss:$148 sps:$4 sm:$0xff]   ;;  %v5322_v4 = vld [vmem:[%s8409_s1 + $0x5cc] ss:$148 sps:$4 sm:$0xff]   ;;  %v5324_v5 = vld [vmem:[%s8409_s1 + $0x5c8] ss:$148 sps:$4 sm:$0xff]  }
   0x3   :  { %3807 = vmatpush1.bf16.msra.mxu0 %v5318_v1  ;;  %v5325_v6 = vld [vmem:[%s8409_s1 + $0x4a4] ss:$148 sps:$4 sm:$0xff]   ;;  %v5327_v7 = vld [vmem:[%s8409_s1 + $0x4a0] ss:$148 sps:$4 sm:$0xff]   ;;  %v5328_v10 = vld [vmem:[%s8409_s1 + $0x37c] ss:$148 sps:$4 sm:$0xff]  }
   0x4   :  { %3808 = vmatprep.subr.bf16.mxu0 %v5319_v2  ;;  %v5339_v8 = vld [vmem:[%s8409_s1 + $0x824] ss:$148 sps:$4 sm:$0xff]   ;;  %v5342_v9 = vld [vmem:[%s8409_s1 + $0x820] ss:$148 sps:$4 sm:$0xff]   ;;  %v5345_v11 = vld [vmem:[%s8409_s1 + $0x6fc] ss:$148 sps:$4 sm:$0xff]  }
   0x5   :  { %3849 = vmatprep.subr.bf16.mxu1 %v5339_v8  ;;  %v5348_v12 = vld [vmem:[%s8409_s1 + $0x6f8] ss:$148 sps:$4 sm:$0xff]   ;;  %v5331_v14 = vld [vmem:[%s8409_s1 + $0x254] ss:$148 sps:$4 sm:$0xff]   ;;  %v5354_v16 = vld [vmem:[%s8409_s1 + $0x5d0] ss:$148 sps:$4 sm:$0xff]  }
   0x6   :  { %3850 = vmatpush1.bf16.msra.mxu1 %v5342_v9  ;;  %v5330_v13 = vld [vmem:[%s8409_s1 + $0x378] ss:$148 sps:$4 sm:$0xff]   ;;  %v5351_v15 = vld [vmem:[%s8409_s1 + $0x5d4] ss:$148 sps:$4 sm:$0xff]   ;;  %v5333_v17 = vld [vmem:[%s8409_s1 + $0x250] ss:$148 sps:$4 sm:$0xff]  }
   0x7   :  { %3809 = vmatpush1.bf16.msra.mxu0 %v5321_v3  ;;  %3851 = vmatprep.subr.bf16.mxu1 %v5345_v11  ;;  %v5357_v18 = vld [vmem:[%s8409_s1 + $0x4ac] ss:$148 sps:$4 sm:$0xff]   ;;  %v5336_v20 = vld [vmem:[%s8409_s1 + $0x128] ss:$148 sps:$4 sm:$0xff]   ;;  %v5363_v22 = vld [vmem:[%s8409_s1 + $0x384] ss:$148 sps:$4 sm:$0xff]  }
   0x8   :  { %3810 = vmatprep.subr.bf16.mxu0 %v5322_v4  ;;  %v5334_v19 = vld [vmem:[%s8409_s1 + $0x12c] ss:$148 sps:$4 sm:$0xff]   ;;  %v5360_v21 = vld [vmem:[%s8409_s1 + $0x4a8] ss:$148 sps:$4 sm:$0xff]   ;;  %v5337_v23 = vld [vmem:[%s8409_s1 + $0x4] ss:$148 sps:$4 sm:$0xff]  }
   0x9   :  { %v5366_v24 = vld [vmem:[%s8409_s1 + $0x380] ss:$148 sps:$4 sm:$0xff]   ;;  %v5369_v26 = vld [vmem:[%s8409_s1 + $0x25c] ss:$148 sps:$4 sm:$0xff]   ;;  %v5347_v28 = vld [vmem:[%s8409_s1 + $0x1158] ss:$148 sps:$4 sm:$0xff]  }
   0xa   :  { %3852 = vmatpush1.bf16.msra.mxu1 %v5348_v12  ;;  %v5341_v25 = vld [vmem:[%s8409_s1] ss:$148 sps:$4 sm:$0xff]   ;;  %v5343_v27 = vld [vmem:[%s8409_s1 + $0x115c] ss:$148 sps:$4 sm:$0xff]   ;;  %v5372_v29 = vld [vmem:[%s8409_s1 + $0x258] ss:$148 sps:$4 sm:$0xff]  }
   0xb   :  { %3811 = vmatpush1.bf16.msra.mxu0 %v5324_v5  ;;  %3853 = vmatprep.subr.bf16.mxu1 %v5351_v15  ;;  %v5375_v30 = vld [vmem:[%s8409_s1 + $0x134] ss:$148 sps:$4 sm:$0xff]   ;;  %v5353_v32 = vld [vmem:[%s8409_s1 + $0x1030] ss:$148 sps:$4 sm:$0xff]   ;;  %v5381_v35 = vld [vmem:[%s8409_s1 + $0xc] ss:$148 sps:$4 sm:$0xff]  }
   0xc   :  { %3812 = vmatprep.subr.bf16.mxu0 %v5325_v6  ;;  %v5349_v31 = vld [vmem:[%s8409_s1 + $0x1034] ss:$148 sps:$4 sm:$0xff]   ;;  %v5378_v33 = vld [vmem:[%s8409_s1 + $0x130] ss:$148 sps:$4 sm:$0xff]   ;;  %v5355_v36 = vld [vmem:[%s8409_s1 + $0xf0c] ss:$148 sps:$4 sm:$0xff]  }
   0xd   :  { %v6330_v34 = vld [vmem:[%s8410_s0 + $0x4] ss:$8 sps:$4 sm:$0xff]   ;;  %v5384_v37 = vld [vmem:[%s8409_s1 + $0x8] ss:$148 sps:$4 sm:$0xff]   ;;  %v5365_v41 = vld [vmem:[%s8409_s1 + $0xde0] ss:$148 sps:$4 sm:$0xff]  }
   0xe   :  { %3854 = vmatpush1.bf16.msra.mxu1 %v5354_v16  ;;  %3838 = vmatprep.mubr.bf16.mxu0 %v6330_v34  ;;  %v5359_v38 = vld [vmem:[%s8409_s1 + $0xf08] ss:$148 sps:$4 sm:$0xff]   ;;  %v5387_v39 = vld [vmem:[%s8409_s1 + $0x1164] ss:$148 sps:$4 sm:$0xff]   ;;  %v5390_v42 = vld [vmem:[%s8409_s1 + $0x1160] ss:$148 sps:$4 sm:$0xff]  }
   0xf   :  { %3813 = vmatpush1.bf16.msra.mxu0 %v5327_v7  ;;  %3855 = vmatprep.subr.bf16.mxu1 %v5357_v18  ;;  %v5361_v40 = vld [vmem:[%s8409_s1 + $0xde4] ss:$148 sps:$4 sm:$0xff]   ;;  %v5394_v43 = vld [vmem:[%s8409_s1 + $0x103c] ss:$148 sps:$4 sm:$0xff]   ;;  %v5400_v47 = vld [vmem:[%s8409_s1 + $0xf14] ss:$148 sps:$4 sm:$0xff]  }
  0x10   :  { %3814 = vmatprep.subr.bf16.mxu0 %v5328_v10  ;;  %3881 = vmatprep.mubr.bf16.mxu1 %v6330_v34  ;;  %v5367_v44 = vld [vmem:[%s8409_s1 + $0xcbc] ss:$148 sps:$4 sm:$0xff]   ;;  %v5399_v45 = vld [vmem:[%s8409_s1 + $0x1038] ss:$148 sps:$4 sm:$0xff]   ;;  %v5373_v48 = vld [vmem:[%s8409_s1 + $0xb94] ss:$148 sps:$4 sm:$0xff]  }
  0x11   :  { %v5371_v46 = vld [vmem:[%s8409_s1 + $0xcb8] ss:$148 sps:$4 sm:$0xff]   ;;  %v5377_v49 = vld [vmem:[%s8409_s1 + $0xb90] ss:$148 sps:$4 sm:$0xff]   ;;  %v5411_v53 = vld [vmem:[%s8409_s1 + $0xde8] ss:$148 sps:$4 sm:$0xff]  }
  0x12   :  { %3856 = vmatpush1.bf16.msra.mxu1 %v5360_v21  ;;  %v5405_v50 = vld [vmem:[%s8409_s1 + $0xf10] ss:$148 sps:$4 sm:$0xff]   ;;  %v5406_v51 = vld [vmem:[%s8409_s1 + $0xdec] ss:$148 sps:$4 sm:$0xff]   ;;  %v5383_v54 = vld [vmem:[%s8409_s1 + $0xa68] ss:$148 sps:$4 sm:$0xff]  }
  0x13   :  { %3815 = vmatpush1.bf16.msra.mxu0 %v5330_v13  ;;  %3857 = vmatprep.subr.bf16.mxu1 %v5363_v22  ;;  %v5379_v52 = vld [vmem:[%s8409_s1 + $0xa6c] ss:$148 sps:$4 sm:$0xff]   ;;  %v5412_v55 = vld [vmem:[%s8409_s1 + $0xcc4] ss:$148 sps:$4 sm:$0xff]   ;;  %v5418_v59 = vld [vmem:[%s8409_s1 + $0xb9c] ss:$148 sps:$4 sm:$0xff]  }
  0x14   :  { %3816 = vmatprep.subr.bf16.mxu0 %v5331_v14  ;;  %v5385_v56 = vld [vmem:[%s8409_s1 + $0x944] ss:$148 sps:$4 sm:$0xff]   ;;  %v5417_v57 = vld [vmem:[%s8409_s1 + $0xcc0] ss:$148 sps:$4 sm:$0xff]   ;;  %v5396_v63 = vld [vmem:[%s8409_s1 + $0x828] ss:$148 sps:$4 sm:$0xff]  }
  0x15   :  { %v5389_v58 = vld [vmem:[%s8409_s1 + $0x940] ss:$148 sps:$4 sm:$0xff]   ;;  %v5423_v62 = vld [vmem:[%s8409_s1 + $0xb98] ss:$148 sps:$4 sm:$0xff]   ;;  %v5429_v2 = vld [vmem:[%s8409_s1 + $0xa70] ss:$148 sps:$4 sm:$0xff]  }
  0x16   :  { %3858 = vmatpush1.bf16.msra.mxu1 %v5366_v24  ;;  %v5398_v60 = vld [vmem:[%s8409_s1 + $0x82c] ss:$148 sps:$4 sm:$0xff]   ;;  %v5424_v0 = vld [vmem:[%s8409_s1 + $0xa74] ss:$148 sps:$4 sm:$0xff]   ;;  %v5404_v1 = vld [vmem:[%s8409_s1 + $0x704] ss:$148 sps:$4 sm:$0xff]  }
  0x17   :  { %3817 = vmatpush1.bf16.msra.mxu0 %v5333_v17  ;;  %3859 = vmatprep.subr.bf16.mxu1 %v5369_v26  ;;  %v6415_v61 = vld [vmem:[%s8410_s0] ss:$8 sps:$4 sm:$0xff]   ;;  %v5410_v5 = vld [vmem:[%s8409_s1 + $0x5dc] ss:$148 sps:$4 sm:$0xff]   ;;  %v5408_v7 = vld [vmem:[%s8409_s1 + $0x5d8] ss:$148 sps:$4 sm:$0xff]  }
  0x18   :  { %3818 = vmatprep.subr.bf16.mxu0 %v5334_v19  ;;  %v5402_v3 = vld [vmem:[%s8409_s1 + $0x700] ss:$148 sps:$4 sm:$0xff]   ;;  %v5435_v6 = vld [vmem:[%s8409_s1 + $0x948] ss:$148 sps:$4 sm:$0xff]   ;;  %v5439_v10 = vld [vmem:[%s8409_s1 + $0x830] ss:$148 sps:$4 sm:$0xff]  }
  0x19   :  { %v5430_v4 = vld [vmem:[%s8409_s1 + $0x94c] ss:$148 sps:$4 sm:$0xff]   ;;  %v5441_v8 = vld [vmem:[%s8409_s1 + $0x834] ss:$148 sps:$4 sm:$0xff]   ;;  %v5414_v11 = vld [vmem:[%s8409_s1 + $0x4b0] ss:$148 sps:$4 sm:$0xff]  }
  0x1a   :  { %3860 = vmatpush1.bf16.msra.mxu1 %v5372_v29  ;;  %v5416_v9 = vld [vmem:[%s8409_s1 + $0x4b4] ss:$148 sps:$4 sm:$0xff]   ;;  %v5447_v12 = vld [vmem:[%s8409_s1 + $0x70c] ss:$148 sps:$4 sm:$0xff]   ;;  %v5453_v16 = vld [vmem:[%s8409_s1 + $0x5e4] ss:$148 sps:$4 sm:$0xff]  }
  0x1b   :  { %3819 = vmatpush1.bf16.msra.mxu0 %v5336_v20  ;;  %3861 = vmatprep.subr.bf16.mxu1 %v5375_v30  ;;  %v5422_v13 = vld [vmem:[%s8409_s1 + $0x38c] ss:$148 sps:$4 sm:$0xff]   ;;  %v5445_v14 = vld [vmem:[%s8409_s1 + $0x708] ss:$148 sps:$4 sm:$0xff]   ;;  %v5428_v17 = vld [vmem:[%s8409_s1 + $0x264] ss:$148 sps:$4 sm:$0xff]  }
  0x1c   :  { %3820 = vmatprep.subr.bf16.mxu0 %v5337_v23  ;;  %v5420_v15 = vld [vmem:[%s8409_s1 + $0x388] ss:$148 sps:$4 sm:$0xff]   ;;  %v5451_v18 = vld [vmem:[%s8409_s1 + $0x5e0] ss:$148 sps:$4 sm:$0xff]   ;;  %v5457_v22 = vld [vmem:[%s8409_s1 + $0x4b8] ss:$148 sps:$4 sm:$0xff]  }
  0x1d   :  { %v5426_v19 = vld [vmem:[%s8409_s1 + $0x260] ss:$148 sps:$4 sm:$0xff]   ;;  %v5459_v20 = vld [vmem:[%s8409_s1 + $0x4bc] ss:$148 sps:$4 sm:$0xff]   ;;  %v5432_v23 = vld [vmem:[%s8409_s1 + $0x138] ss:$148 sps:$4 sm:$0xff]  }
  0x1e   :  { %3862 = vmatpush1.bf16.msra.mxu1 %v5378_v33  ;;  %v5434_v21 = vld [vmem:[%s8409_s1 + $0x13c] ss:$148 sps:$4 sm:$0xff]   ;;  %v5465_v24 = vld [vmem:[%s8409_s1 + $0x394] ss:$148 sps:$4 sm:$0xff]   ;;  %v5444_v29 = vld [vmem:[%s8409_s1 + $0x116c] ss:$148 sps:$4 sm:$0xff]  }
  0x1f   :  { %3821 = vmatpush1.bf16.msra.mxu0 %v5341_v25  ;;  %3863 = vmatprep.subr.bf16.mxu1 %v5381_v35  ;;  %v5438_v25 = vld [vmem:[%s8409_s1 + $0x14] ss:$148 sps:$4 sm:$0xff]   ;;  %v5463_v26 = vld [vmem:[%s8409_s1 + $0x390] ss:$148 sps:$4 sm:$0xff]  }
  0x20   :  { %3822 = vmatprep.subr.bf16.mxu0 %v5343_v27  ;;  %v5436_v27 = vld [vmem:[%s8409_s1 + $0x10] ss:$148 sps:$4 sm:$0xff]   ;;  %v5469_v30 = vld [vmem:[%s8409_s1 + $0x268] ss:$148 sps:$4 sm:$0xff]   ;;  %v5475_v35 = vld [vmem:[%s8409_s1 + $0x140] ss:$148 sps:$4 sm:$0xff]  }
  0x21   :  { %v5450_v33 = vld [vmem:[%s8409_s1 + $0x1044] ss:$148 sps:$4 sm:$0xff]  }
  0x22   :  { %3864 = vmatpush1.bf16.msra.mxu1 %v5384_v37  ;;  %v5483_v37 = vld [vmem:[%s8409_s1 + $0x1c] ss:$148 sps:$4 sm:$0xff]  }
  0x23   :  { %3823 = vmatpush2.bf16.msra.mxu0 %v5347_v28  ;;  %3865 = vmatprep.subr.bf16.mxu1 %v5387_v39  ;;  %v5471_v28 = vld [vmem:[%s8409_s1 + $0x26c] ss:$148 sps:$4 sm:$0xff]  }
  0x24   :  { %3824 = vmatprep.subr.bf16.mxu0 %v5349_v31  ;;  %v5442_v31 = vld [vmem:[%s8409_s1 + $0x1168] ss:$148 sps:$4 sm:$0xff]   ;;  %v5481_v39 = vld [vmem:[%s8409_s1 + $0x18] ss:$148 sps:$4 sm:$0xff]  }
  0x26   :  { %3866 = vmatpush2.bf16.msra.mxu1 %v5390_v42  ;;  %v5462_v42 = vld [vmem:[%s8409_s1 + $0xdf4] ss:$148 sps:$4 sm:$0xff]  }
  0x27   :  { %3825 = vmatpush2.bf16.msra.mxu0 %v5353_v32  ;;  %3867 = vmatprep.subr.bf16.mxu1 %v5394_v43  ;;  %v5477_v32 = vld [vmem:[%s8409_s1 + $0x144] ss:$148 sps:$4 sm:$0xff]  }
  0x28   :  { %3826 = vmatprep.subr.bf16.mxu0 %v5355_v36  ;;  %v5448_v36 = vld [vmem:[%s8409_s1 + $0x1040] ss:$148 sps:$4 sm:$0xff]   ;;  %v5487_v43 = vld [vmem:[%s8409_s1 + $0x1170] ss:$148 sps:$4 sm:$0xff]  }
  0x2a   :  { %3868 = vmatpush2.bf16.msra.mxu1 %v5399_v45  ;;  %v5492_v45 = vld [vmem:[%s8409_s1 + $0x104c] ss:$148 sps:$4 sm:$0xff]  }
  0x2b   :  { %3827 = vmatpush2.bf16.msra.mxu0 %v5359_v38  ;;  %3869 = vmatprep.subr.bf16.mxu1 %v5400_v47  ;;  %v5456_v38 = vld [vmem:[%s8409_s1 + $0xf1c] ss:$148 sps:$4 sm:$0xff]  }
  0x2c   :  { %3828 = vmatprep.subr.bf16.mxu0 %v5361_v40  ;;  %v5454_v40 = vld [vmem:[%s8409_s1 + $0xf18] ss:$148 sps:$4 sm:$0xff]   ;;  %v5490_v47 = vld [vmem:[%s8409_s1 + $0x1048] ss:$148 sps:$4 sm:$0xff]  }
  0x2e   :  { %3870 = vmatpush2.bf16.msra.mxu1 %v5405_v50  ;;  %v5474_v50 = vld [vmem:[%s8409_s1 + $0xba4] ss:$148 sps:$4 sm:$0xff]  }
  0x2f   :  { %3829 = vmatpush2.bf16.msra.mxu0 %v5365_v41  ;;  %3871 = vmatprep.subr.bf16.mxu1 %v5406_v51  ;;  %v5489_v41 = vld [vmem:[%s8409_s1 + $0x1174] ss:$148 sps:$4 sm:$0xff]  }
  0x30   :  { %3830 = vmatprep.subr.bf16.mxu0 %v5367_v44  ;;  %v5460_v44 = vld [vmem:[%s8409_s1 + $0xdf0] ss:$148 sps:$4 sm:$0xff]   ;;  %v5496_v51 = vld [vmem:[%s8409_s1 + $0xf20] ss:$148 sps:$4 sm:$0xff]  }
  0x32   :  { %3872 = vmatpush2.bf16.msra.mxu1 %v5411_v53  ;;  %v5504_v53 = vld [vmem:[%s8409_s1 + $0xdfc] ss:$148 sps:$4 sm:$0xff]  }
  0x33   :  { %3831 = vmatpush2.bf16.msra.mxu0 %v5371_v46  ;;  %3873 = vmatprep.subr.bf16.mxu1 %v5412_v55  ;;  %v5468_v46 = vld [vmem:[%s8409_s1 + $0xccc] ss:$148 sps:$4 sm:$0xff]  }
  0x34   :  { %3832 = vmatprep.subr.bf16.mxu0 %v5373_v48  ;;  %v5466_v48 = vld [vmem:[%s8409_s1 + $0xcc8] ss:$148 sps:$4 sm:$0xff]   ;;  %v5502_v55 = vld [vmem:[%s8409_s1 + $0xdf8] ss:$148 sps:$4 sm:$0xff]  }
  0x36   :  { %3874 = vmatpush2.bf16.msra.mxu1 %v5417_v57  ;;  %v5510_v57 = vld [vmem:[%s8409_s1 + $0xcd4] ss:$148 sps:$4 sm:$0xff]  }
  0x37   :  { %3833 = vmatpush2.bf16.msra.mxu0 %v5377_v49  ;;  %3875 = vmatprep.subr.bf16.mxu1 %v5418_v59  ;;  %v5498_v49 = vld [vmem:[%s8409_s1 + $0xf24] ss:$148 sps:$4 sm:$0xff]  }
  0x38   :  { %3834 = vmatprep.subr.bf16.mxu0 %v5379_v52  ;;  %v5472_v52 = vld [vmem:[%s8409_s1 + $0xba0] ss:$148 sps:$4 sm:$0xff]   ;;  %v5508_v59 = vld [vmem:[%s8409_s1 + $0xcd0] ss:$148 sps:$4 sm:$0xff]  }
  0x3a   :  { %3876 = vmatpush2.bf16.msra.mxu1 %v5423_v62  ;;  %v5516_v62 = vld [vmem:[%s8409_s1 + $0xbac] ss:$148 sps:$4 sm:$0xff]  }
  0x3b   :  { %3835 = vmatpush2.bf16.msra.mxu0 %v5383_v54  ;;  %3877 = vmatprep.subr.bf16.mxu1 %v5424_v0  ;;  %v5480_v54 = vld [vmem:[%s8409_s1 + $0xa7c] ss:$148 sps:$4 sm:$0xff]  }
  0x3c   :  { %3836 = vmatprep.subr.bf16.mxu0 %v5385_v56  ;;  %v5478_v56 = vld [vmem:[%s8409_s1 + $0xa78] ss:$148 sps:$4 sm:$0xff]   ;;  %v5514_v0 = vld [vmem:[%s8409_s1 + $0xba8] ss:$148 sps:$4 sm:$0xff]  }
  0x3e   :  { %3878 = vmatpush2.bf16.msra.mxu1 %v5429_v2  ;;  %v5522_v2 = vld [vmem:[%s8409_s1 + $0xa84] ss:$148 sps:$4 sm:$0xff]  }
  0x3f   :  { %3837 = vmatpush2.bf16.msra.mxu0 %v5389_v58  ;;  %3879 = vmatprep.subr.bf16.mxu1 %v5430_v4  ;;  %v5486_v58 = vld [vmem:[%s8409_s1 + $0x954] ss:$148 sps:$4 sm:$0xff]  }
  0x40   :  { %3892 = vmatprep.subr.bf16.mxu0 %v5398_v60  ;;  %v5484_v60 = vld [vmem:[%s8409_s1 + $0x950] ss:$148 sps:$4 sm:$0xff]   ;;  %v5520_v4 = vld [vmem:[%s8409_s1 + $0xa80] ss:$148 sps:$4 sm:$0xff]  }
  0x42   :  { %3839 = vmatmul.mubr.bf16.vlgmr.msra.gmra.mxu0 %v6415_v61  ;;  %3880 = vmatpush2.bf16.msra.mxu1 %v5435_v6  ;;  %v5528_v6 = vld [vmem:[%s8409_s1 + $0x95c] ss:$148 sps:$4 sm:$0xff]  }
  0x43   :  { %3893 = vmatpush1.bf16.msra.mxu0 %v5396_v63  ;;  %3924 = vmatprep.mubr.bf16.mxu0 %v6330_v34  ;;  %v5495_v63 = vld [vmem:[%s8409_s1 + $0x83c] ss:$148 sps:$4 sm:$0xff]  }
  0x44   :  { %3894 = vmatprep.subr.bf16.mxu0 %v5404_v1  ;;  %3935 = vmatprep.subr.bf16.mxu1 %v5441_v8  ;;  %v5493_v1 = vld [vmem:[%s8409_s1 + $0x838] ss:$148 sps:$4 sm:$0xff]  }
  0x45   :  { %3882 = vmatmul.mubr.bf16.vlgmr.msra.gmra.mxu1 %v6415_v61  ;;  %v5526_v8 = vld [vmem:[%s8409_s1 + $0x958] ss:$148 sps:$4 sm:$0xff]  }
  0x46   :  { %3936 = vmatpush1.bf16.msra.mxu1 %v5439_v10  ;;  %3967 = vmatprep.mubr.bf16.mxu1 %v6330_v34  ;;  %v5537_v10 = vld [vmem:[%s8409_s1 + $0x844] ss:$148 sps:$4 sm:$0xff]  }
  0x47   :  { %3895 = vmatpush1.bf16.msra.mxu0 %v5402_v3  ;;  %3937 = vmatprep.subr.bf16.mxu1 %v5447_v12  ;;  %v5501_v3 = vld [vmem:[%s8409_s1 + $0x714] ss:$148 sps:$4 sm:$0xff]  }
  0x48   :  { %3896 = vmatprep.subr.bf16.mxu0 %v5410_v5  ;;  %v5499_v5 = vld [vmem:[%s8409_s1 + $0x710] ss:$148 sps:$4 sm:$0xff]   ;;  %v5535_v12 = vld [vmem:[%s8409_s1 + $0x840] ss:$148 sps:$4 sm:$0xff]  }
  0x4a   :  { %3938 = vmatpush1.bf16.msra.mxu1 %v5445_v14  ;;  %v5543_v14 = vld [vmem:[%s8409_s1 + $0x71c] ss:$148 sps:$4 sm:$0xff]  }
  0x4b   :  { %3897 = vmatpush1.bf16.msra.mxu0 %v5408_v7  ;;  %3939 = vmatprep.subr.bf16.mxu1 %v5453_v16  ;;  %v5507_v7 = vld [vmem:[%s8409_s1 + $0x5ec] ss:$148 sps:$4 sm:$0xff]  }
  0x4c   :  { %3898 = vmatprep.subr.bf16.mxu0 %v5416_v9  ;;  %v5505_v9 = vld [vmem:[%s8409_s1 + $0x5e8] ss:$148 sps:$4 sm:$0xff]   ;;  %v5541_v16 = vld [vmem:[%s8409_s1 + $0x718] ss:$148 sps:$4 sm:$0xff]  }
  0x4e   :  { %3940 = vmatpush1.bf16.msra.mxu1 %v5451_v18  ;;  %v5549_v18 = vld [vmem:[%s8409_s1 + $0x5f4] ss:$148 sps:$4 sm:$0xff]  }
  0x4f   :  { %3899 = vmatpush1.bf16.msra.mxu0 %v5414_v11  ;;  %3941 = vmatprep.subr.bf16.mxu1 %v5459_v20  ;;  %v5513_v11 = vld [vmem:[%s8409_s1 + $0x4c4] ss:$148 sps:$4 sm:$0xff]  }
  0x50   :  { %3900 = vmatprep.subr.bf16.mxu0 %v5422_v13  ;;  %v5511_v13 = vld [vmem:[%s8409_s1 + $0x4c0] ss:$148 sps:$4 sm:$0xff]   ;;  %v5523_v20 = vld [vmem:[%s8409_s1 + $0x270] ss:$148 sps:$4 sm:$0xff]  }
  0x52   :  { %3942 = vmatpush1.bf16.msra.mxu1 %v5457_v22  ;;  %v5531_v22 = vld [vmem:[%s8409_s1 + $0x14c] ss:$148 sps:$4 sm:$0xff]  }
  0x53   :  { %3901 = vmatpush1.bf16.msra.mxu0 %v5420_v15  ;;  %3943 = vmatprep.subr.bf16.mxu1 %v5465_v24  ;;  %v5519_v15 = vld [vmem:[%s8409_s1 + $0x39c] ss:$148 sps:$4 sm:$0xff]  }
  0x54   :  { %3902 = vmatprep.subr.bf16.mxu0 %v5428_v17  ;;  %v5517_v17 = vld [vmem:[%s8409_s1 + $0x398] ss:$148 sps:$4 sm:$0xff]   ;;  %v5529_v24 = vld [vmem:[%s8409_s1 + $0x148] ss:$148 sps:$4 sm:$0xff]  }
  0x56   :  { %3944 = vmatpush1.bf16.msra.mxu1 %v5463_v26  ;;  %v5534_v26 = vld [vmem:[%s8409_s1 + $0x24] ss:$148 sps:$4 sm:$0xff]  }
  0x57   :  { %3903 = vmatpush1.bf16.msra.mxu0 %v5426_v19  ;;  %3945 = vmatprep.subr.bf16.mxu1 %v5471_v28  ;;  %v5525_v19 = vld [vmem:[%s8409_s1 + $0x274] ss:$148 sps:$4 sm:$0xff]  }
  0x58   :  { %3904 = vmatprep.subr.bf16.mxu0 %v5434_v21  ;;  %v5555_v21 = vld [vmem:[%s8409_s1 + $0x4cc] ss:$148 sps:$4 sm:$0xff]  }
  0x59   :  { %v5532_v28 = vld [vmem:[%s8409_s1 + $0x20] ss:$148 sps:$4 sm:$0xff]  }
  0x5a   :  { %3946 = vmatpush1.bf16.msra.mxu1 %v5469_v30  ;;  %v5540_v30 = vld [vmem:[%s8409_s1 + $0x117c] ss:$148 sps:$4 sm:$0xff]  }
  0x5b   :  { %3905 = vmatpush1.bf16.msra.mxu0 %v5432_v23  ;;  %3947 = vmatprep.subr.bf16.mxu1 %v5477_v32  ;;  %v5553_v23 = vld [vmem:[%s8409_s1 + $0x4c8] ss:$148 sps:$4 sm:$0xff]   ;;  %v5538_v32 = vld [vmem:[%s8409_s1 + $0x1178] ss:$148 sps:$4 sm:$0xff]  }
  0x5c   :  { %3906 = vmatprep.subr.bf16.mxu0 %v5438_v25  ;;  %v5561_v25 = vld [vmem:[%s8409_s1 + $0x3a4] ss:$148 sps:$4 sm:$0xff]  }
  0x5e   :  { %3948 = vmatpush1.bf16.msra.mxu1 %v5475_v35  ;;  %v5546_v35 = vld [vmem:[%s8409_s1 + $0x1054] ss:$148 sps:$4 sm:$0xff]  }
  0x5f   :  { %3907 = vmatpush1.bf16.msra.mxu0 %v5436_v27  ;;  %3949 = vmatprep.subr.bf16.mxu1 %v5483_v37  ;;  %v5559_v27 = vld [vmem:[%s8409_s1 + $0x3a0] ss:$148 sps:$4 sm:$0xff]   ;;  %v5571_v37 = vld [vmem:[%s8409_s1 + $0x150] ss:$148 sps:$4 sm:$0xff]  }
  0x60   :  { %3908 = vmatprep.subr.bf16.mxu0 %v5444_v29  ;;  %v5567_v29 = vld [vmem:[%s8409_s1 + $0x27c] ss:$148 sps:$4 sm:$0xff]  }
  0x62   :  { %3950 = vmatpush1.bf16.msra.mxu1 %v5481_v39  ;;  %v5552_v39 = vld [vmem:[%s8409_s1 + $0xf2c] ss:$148 sps:$4 sm:$0xff]  }
  0x63   :  { %3909 = vmatpush2.bf16.msra.mxu0 %v5442_v31  ;;  %3951 = vmatprep.subr.bf16.mxu1 %v5489_v41  ;;  %v5565_v31 = vld [vmem:[%s8409_s1 + $0x278] ss:$148 sps:$4 sm:$0xff]   ;;  %v5577_v41 = vld [vmem:[%s8409_s1 + $0x28] ss:$148 sps:$4 sm:$0xff]  }
  0x64   :  { %3910 = vmatprep.subr.bf16.mxu0 %v5450_v33  ;;  %v5573_v33 = vld [vmem:[%s8409_s1 + $0x154] ss:$148 sps:$4 sm:$0xff]  }
  0x66   :  { %3952 = vmatpush2.bf16.msra.mxu1 %v5487_v43  ;;  %v5558_v43 = vld [vmem:[%s8409_s1 + $0xe04] ss:$148 sps:$4 sm:$0xff]  }
  0x67   :  { %3911 = vmatpush2.bf16.msra.mxu0 %v5448_v36  ;;  %3953 = vmatprep.subr.bf16.mxu1 %v5492_v45  ;;  %v5544_v36 = vld [vmem:[%s8409_s1 + $0x1050] ss:$148 sps:$4 sm:$0xff]   ;;  %v5583_v45 = vld [vmem:[%s8409_s1 + $0x1180] ss:$148 sps:$4 sm:$0xff]  }
  0x68   :  { %3912 = vmatprep.subr.bf16.mxu0 %v5456_v38  ;;  %v5579_v38 = vld [vmem:[%s8409_s1 + $0x2c] ss:$148 sps:$4 sm:$0xff]  }
  0x6a   :  { %3954 = vmatpush2.bf16.msra.mxu1 %v5490_v47  ;;  %v5564_v47 = vld [vmem:[%s8409_s1 + $0xcdc] ss:$148 sps:$4 sm:$0xff]  }
  0x6b   :  { %3913 = vmatpush2.bf16.msra.mxu0 %v5454_v40  ;;  %3955 = vmatprep.subr.bf16.mxu1 %v5498_v49  ;;  %v5550_v40 = vld [vmem:[%s8409_s1 + $0xf28] ss:$148 sps:$4 sm:$0xff]   ;;  %v5586_v49 = vld [vmem:[%s8409_s1 + $0x1058] ss:$148 sps:$4 sm:$0xff]  }
  0x6c   :  { %3914 = vmatprep.subr.bf16.mxu0 %v5462_v42  ;;  %v5585_v42 = vld [vmem:[%s8409_s1 + $0x1184] ss:$148 sps:$4 sm:$0xff]  }
  0x6e   :  { %3956 = vmatpush2.bf16.msra.mxu1 %v5496_v51  ;;  %v5570_v51 = vld [vmem:[%s8409_s1 + $0xbb4] ss:$148 sps:$4 sm:$0xff]  }
  0x6f   :  { %3915 = vmatpush2.bf16.msra.mxu0 %v5460_v44  ;;  %3957 = vmatprep.subr.bf16.mxu1 %v5504_v53  ;;  %v5556_v44 = vld [vmem:[%s8409_s1 + $0xe00] ss:$148 sps:$4 sm:$0xff]   ;;  %v5592_v53 = vld [vmem:[%s8409_s1 + $0xf30] ss:$148 sps:$4 sm:$0xff]  }
  0x70   :  { %3916 = vmatprep.subr.bf16.mxu0 %v5468_v46  ;;  %v5588_v46 = vld [vmem:[%s8409_s1 + $0x105c] ss:$148 sps:$4 sm:$0xff]  }
  0x72   :  { %3958 = vmatpush2.bf16.msra.mxu1 %v5502_v55  ;;  %v5576_v55 = vld [vmem:[%s8409_s1 + $0xa8c] ss:$148 sps:$4 sm:$0xff]  }
  0x73   :  { %3917 = vmatpush2.bf16.msra.mxu0 %v5466_v48  ;;  %3959 = vmatprep.subr.bf16.mxu1 %v5510_v57  ;;  %v5562_v48 = vld [vmem:[%s8409_s1 + $0xcd8] ss:$148 sps:$4 sm:$0xff]   ;;  %v5598_v57 = vld [vmem:[%s8409_s1 + $0xe08] ss:$148 sps:$4 sm:$0xff]  }
  0x74   :  { %3918 = vmatprep.subr.bf16.mxu0 %v5474_v50  ;;  %v5594_v50 = vld [vmem:[%s8409_s1 + $0xf34] ss:$148 sps:$4 sm:$0xff]  }
  0x76   :  { %3960 = vmatpush2.bf16.msra.mxu1 %v5508_v59  ;;  %v5582_v59 = vld [vmem:[%s8409_s1 + $0x964] ss:$148 sps:$4 sm:$0xff]  }
  0x77   :  { %3919 = vmatpush2.bf16.msra.mxu0 %v5472_v52  ;;  %3961 = vmatprep.subr.bf16.mxu1 %v5516_v62  ;;  %v5568_v52 = vld [vmem:[%s8409_s1 + $0xbb0] ss:$148 sps:$4 sm:$0xff]   ;;  %v5604_v62 = vld [vmem:[%s8409_s1 + $0xce0] ss:$148 sps:$4 sm:$0xff]  }
  0x78   :  { %3920 = vmatprep.subr.bf16.mxu0 %v5480_v54  ;;  %v5600_v54 = vld [vmem:[%s8409_s1 + $0xe0c] ss:$148 sps:$4 sm:$0xff]  }
  0x7a   :  { %3962 = vmatpush2.bf16.msra.mxu1 %v5514_v0  ;;  %v5591_v0 = vld [vmem:[%s8409_s1 + $0x84c] ss:$148 sps:$4 sm:$0xff]  }
  0x7b   :  { %3921 = vmatpush2.bf16.msra.mxu0 %v5478_v56  ;;  %3963 = vmatprep.subr.bf16.mxu1 %v5522_v2  ;;  %v5574_v56 = vld [vmem:[%s8409_s1 + $0xa88] ss:$148 sps:$4 sm:$0xff]   ;;  %v5610_v2 = vld [vmem:[%s8409_s1 + $0xbb8] ss:$148 sps:$4 sm:$0xff]  }
  0x7c   :  { %3922 = vmatprep.subr.bf16.mxu0 %v5486_v58  ;;  %v5606_v58 = vld [vmem:[%s8409_s1 + $0xce4] ss:$148 sps:$4 sm:$0xff]  }
  0x7e   :  { %3964 = vmatpush2.bf16.msra.mxu1 %v5520_v4  ;;  %v5597_v4 = vld [vmem:[%s8409_s1 + $0x724] ss:$148 sps:$4 sm:$0xff]  }
  0x7f   :  { %3923 = vmatpush2.bf16.msra.mxu0 %v5484_v60  ;;  %3965 = vmatprep.subr.bf16.mxu1 %v5528_v6  ;;  %v5580_v60 = vld [vmem:[%s8409_s1 + $0x960] ss:$148 sps:$4 sm:$0xff]   ;;  %v5616_v6 = vld [vmem:[%s8409_s1 + $0xa90] ss:$148 sps:$4 sm:$0xff]  }
  0x80   :  { %3978 = vmatprep.subr.bf16.mxu0 %v5495_v63  ;;  %v5612_v63 = vld [vmem:[%s8409_s1 + $0xbbc] ss:$148 sps:$4 sm:$0xff]  }
  0x82   :  { %3925 = vmatmul.mubr.bf16.vlgmr.msra.gmra.mxu0 %v6415_v61  ;;  %3966 = vmatpush2.bf16.msra.mxu1 %v5526_v8  ;;  %v6837_v8 = vld [vmem:[%s8410_s0 + $0x4] ss:$8 sps:$4 sm:$0xff]  }
  0x83   :  { %3979 = vmatpush1.bf16.msra.mxu0 %v5493_v1  ;;  %4010 = vmatprep.mubr.bf16.mxu0 %v6330_v34  ;;  %v5589_v1 = vld [vmem:[%s8409_s1 + $0x848] ss:$148 sps:$4 sm:$0xff]  }
  0x84   :  { %3980 = vmatprep.subr.bf16.mxu0 %v5501_v3  ;;  %4021 = vmatprep.subr.bf16.mxu1 %v5537_v10  ;;  %v5618_v3 = vld [vmem:[%s8409_s1 + $0xa94] ss:$148 sps:$4 sm:$0xff]  }
  0x85   :  { %3968 = vmatmul.mubr.bf16.vlgmr.msra.gmra.mxu1 %v6415_v61  ;;  %v5622_v10 = vld [vmem:[%s8409_s1 + $0x968] ss:$148 sps:$4 sm:$0xff]  }
  0x86   :  { %4022 = vmatpush1.bf16.msra.mxu1 %v5535_v12  ;;  %4053 = vmatprep.mubr.bf16.mxu1 %v6330_v34  ;;  %v5547_v34 = vld [vmem:[%s8409_s1 + $0x5f0] ss:$148 sps:$4 sm:$0xff]   ;;  %v5609_v12 = vld [vmem:[%s8409_s1 + $0x4d4] ss:$148 sps:$4 sm:$0xff]  }
  0x87   :  { %3981 = vmatpush1.bf16.msra.mxu0 %v5499_v5  ;;  %4023 = vmatprep.subr.bf16.mxu1 %v5543_v14  ;;  %v5595_v5 = vld [vmem:[%s8409_s1 + $0x720] ss:$148 sps:$4 sm:$0xff]   ;;  %v5631_v14 = vld [vmem:[%s8409_s1 + $0x850] ss:$148 sps:$4 sm:$0xff]  }
  0x88   :  { %3982 = vmatprep.subr.bf16.mxu0 %v5507_v7  ;;  %v5624_v7 = vld [vmem:[%s8409_s1 + $0x96c] ss:$148 sps:$4 sm:$0xff]  }
  0x8a   :  { %4024 = vmatpush1.bf16.msra.mxu1 %v5541_v16  ;;  %v5615_v16 = vld [vmem:[%s8409_s1 + $0x3ac] ss:$148 sps:$4 sm:$0xff]  }
  0x8b   :  { %3983 = vmatpush1.bf16.msra.mxu0 %v5505_v9  ;;  %4025 = vmatprep.subr.bf16.mxu1 %v5549_v18  ;;  %v5601_v9 = vld [vmem:[%s8409_s1 + $0x5f8] ss:$148 sps:$4 sm:$0xff]   ;;  %v5613_v18 = vld [vmem:[%s8409_s1 + $0x3a8] ss:$148 sps:$4 sm:$0xff]  }
  0x8c   :  { %3984 = vmatprep.subr.bf16.mxu0 %v5513_v11  ;;  %v5633_v11 = vld [vmem:[%s8409_s1 + $0x854] ss:$148 sps:$4 sm:$0xff]  }
  0x8e   :  { %4026 = vmatpush1.bf16.msra.mxu1 %v5547_v34  ;;  %v5645_v34 = vld [vmem:[%s8409_s1 + $0x604] ss:$148 sps:$4 sm:$0xff]  }
  0x8f   :  { %3985 = vmatpush1.bf16.msra.mxu0 %v5511_v13  ;;  %4027 = vmatprep.subr.bf16.mxu1 %v5555_v21  ;;  %v5607_v13 = vld [vmem:[%s8409_s1 + $0x4d0] ss:$148 sps:$4 sm:$0xff]   ;;  %v5619_v21 = vld [vmem:[%s8409_s1 + $0x280] ss:$148 sps:$4 sm:$0xff]  }
  0x90   :  { %3986 = vmatprep.subr.bf16.mxu0 %v5519_v15  ;;  %v5639_v15 = vld [vmem:[%s8409_s1 + $0x72c] ss:$148 sps:$4 sm:$0xff]  }
  0x92   :  { %4028 = vmatpush1.bf16.msra.mxu1 %v5553_v23  ;;  %v5651_v23 = vld [vmem:[%s8409_s1 + $0x4dc] ss:$148 sps:$4 sm:$0xff]  }
  0x93   :  { %3987 = vmatpush1.bf16.msra.mxu0 %v5517_v17  ;;  %4029 = vmatprep.subr.bf16.mxu1 %v5561_v25  ;;  %v6867_v17 = vld [vmem:[%s8410_s0] ss:$8 sps:$4 sm:$0xff]   ;;  %v5625_v25 = vld [vmem:[%s8409_s1 + $0x158] ss:$148 sps:$4 sm:$0xff]  }
  0x94   :  { %3988 = vmatprep.subr.bf16.mxu0 %v5525_v19  ;;  %v5637_v19 = vld [vmem:[%s8409_s1 + $0x728] ss:$148 sps:$4 sm:$0xff]  }
  0x96   :  { %4030 = vmatpush1.bf16.msra.mxu1 %v5559_v27  ;;  %v5657_v27 = vld [vmem:[%s8409_s1 + $0x3b4] ss:$148 sps:$4 sm:$0xff]  }
  0x97   :  { %3989 = vmatpush1.bf16.msra.mxu0 %v5523_v20  ;;  %4031 = vmatprep.subr.bf16.mxu1 %v5567_v29  ;;  %v5621_v20 = vld [vmem:[%s8409_s1 + $0x284] ss:$148 sps:$4 sm:$0xff]  }
  0x98   :  { %3990 = vmatprep.subr.bf16.mxu0 %v5531_v22  ;;  %v5643_v22 = vld [vmem:[%s8409_s1 + $0x600] ss:$148 sps:$4 sm:$0xff]   ;;  %v5628_v29 = vld [vmem:[%s8409_s1 + $0x30] ss:$148 sps:$4 sm:$0xff]  }
  0x9a   :  { %4032 = vmatpush1.bf16.msra.mxu1 %v5565_v31  ;;  %v5663_v31 = vld [vmem:[%s8409_s1 + $0x28c] ss:$148 sps:$4 sm:$0xff]  }
  0x9b   :  { %3991 = vmatpush1.bf16.msra.mxu0 %v5529_v24  ;;  %4033 = vmatprep.subr.bf16.mxu1 %v5573_v33  ;;  %v5627_v24 = vld [vmem:[%s8409_s1 + $0x15c] ss:$148 sps:$4 sm:$0xff]  }
  0x9c   :  { %3992 = vmatprep.subr.bf16.mxu0 %v5534_v26  ;;  %v5649_v26 = vld [vmem:[%s8409_s1 + $0x4d8] ss:$148 sps:$4 sm:$0xff]   ;;  %v5634_v33 = vld [vmem:[%s8409_s1 + $0x1188] ss:$148 sps:$4 sm:$0xff]  }
  0x9e   :  { %4034 = vmatpush1.bf16.msra.mxu1 %v5571_v37  ;;  %v5642_v37 = vld [vmem:[%s8409_s1 + $0x1064] ss:$148 sps:$4 sm:$0xff]  }
  0x9f   :  { %3993 = vmatpush1.bf16.msra.mxu0 %v5532_v28  ;;  %4035 = vmatprep.subr.bf16.mxu1 %v5579_v38  ;;  %v5630_v28 = vld [vmem:[%s8409_s1 + $0x34] ss:$148 sps:$4 sm:$0xff]  }
  0xa0   :  { %3994 = vmatprep.subr.bf16.mxu0 %v5540_v30  ;;  %v5655_v30 = vld [vmem:[%s8409_s1 + $0x3b0] ss:$148 sps:$4 sm:$0xff]   ;;  %v5640_v38 = vld [vmem:[%s8409_s1 + $0x1060] ss:$148 sps:$4 sm:$0xff]  }
  0xa2   :  { %4036 = vmatpush1.bf16.msra.mxu1 %v5577_v41  ;;  %v5648_v41 = vld [vmem:[%s8409_s1 + $0xf3c] ss:$148 sps:$4 sm:$0xff]  }
  0xa3   :  { %3995 = vmatpush2.bf16.msra.mxu0 %v5538_v32  ;;  %4037 = vmatprep.subr.bf16.mxu1 %v5585_v42  ;;  %v5636_v32 = vld [vmem:[%s8409_s1 + $0x118c] ss:$148 sps:$4 sm:$0xff]  }
  0xa4   :  { %3996 = vmatprep.subr.bf16.mxu0 %v5546_v35  ;;  %v5661_v35 = vld [vmem:[%s8409_s1 + $0x288] ss:$148 sps:$4 sm:$0xff]   ;;  %v5646_v42 = vld [vmem:[%s8409_s1 + $0xf38] ss:$148 sps:$4 sm:$0xff]  }
  0xa6   :  { %4038 = vmatpush2.bf16.msra.mxu1 %v5583_v45  ;;  %v5654_v45 = vld [vmem:[%s8409_s1 + $0xe14] ss:$148 sps:$4 sm:$0xff]  }
  0xa7   :  { %3997 = vmatpush2.bf16.msra.mxu0 %v5544_v36  ;;  %4039 = vmatprep.subr.bf16.mxu1 %v5588_v46  ;;  %v5669_v36 = vld [vmem:[%s8409_s1 + $0x164] ss:$148 sps:$4 sm:$0xff]  }
  0xa8   :  { %3998 = vmatprep.subr.bf16.mxu0 %v5552_v39  ;;  %v5667_v39 = vld [vmem:[%s8409_s1 + $0x160] ss:$148 sps:$4 sm:$0xff]   ;;  %v5652_v46 = vld [vmem:[%s8409_s1 + $0xe10] ss:$148 sps:$4 sm:$0xff]  }
  0xaa   :  { %4040 = vmatpush2.bf16.msra.mxu1 %v5586_v49  ;;  %v5660_v49 = vld [vmem:[%s8409_s1 + $0xcec] ss:$148 sps:$4 sm:$0xff]  }
  0xab   :  { %3999 = vmatpush2.bf16.msra.mxu0 %v5550_v40  ;;  %4041 = vmatprep.subr.bf16.mxu1 %v5594_v50  ;;  %v5675_v40 = vld [vmem:[%s8409_s1 + $0x3c] ss:$148 sps:$4 sm:$0xff]  }
  0xac   :  { %4000 = vmatprep.subr.bf16.mxu0 %v5558_v43  ;;  %v5673_v43 = vld [vmem:[%s8409_s1 + $0x38] ss:$148 sps:$4 sm:$0xff]   ;;  %v5682_v50 = vld [vmem:[%s8409_s1 + $0x1068] ss:$148 sps:$4 sm:$0xff]  }
  0xae   :  { %4042 = vmatpush2.bf16.msra.mxu1 %v5592_v53  ;;  %v5666_v53 = vld [vmem:[%s8409_s1 + $0xbc4] ss:$148 sps:$4 sm:$0xff]  }
  0xaf   :  { %4001 = vmatpush2.bf16.msra.mxu0 %v5556_v44  ;;  %4043 = vmatprep.subr.bf16.mxu1 %v5600_v54  ;;  %v5681_v44 = vld [vmem:[%s8409_s1 + $0x1194] ss:$148 sps:$4 sm:$0xff]  }
  0xb0   :  { %4002 = vmatprep.subr.bf16.mxu0 %v5564_v47  ;;  %v5679_v47 = vld [vmem:[%s8409_s1 + $0x1190] ss:$148 sps:$4 sm:$0xff]   ;;  %v5688_v54 = vld [vmem:[%s8409_s1 + $0xf40] ss:$148 sps:$4 sm:$0xff]  }
  0xb2   :  { %4044 = vmatpush2.bf16.msra.mxu1 %v5598_v57  ;;  %v5696_v57 = vld [vmem:[%s8409_s1 + $0xe1c] ss:$148 sps:$4 sm:$0xff]  }
  0xb3   :  { %4003 = vmatpush2.bf16.msra.mxu0 %v5562_v48  ;;  %4045 = vmatprep.subr.bf16.mxu1 %v5606_v58  ;;  %v5684_v48 = vld [vmem:[%s8409_s1 + $0x106c] ss:$148 sps:$4 sm:$0xff]   ;;  %v5672_v58 = vld [vmem:[%s8409_s1 + $0xa9c] ss:$148 sps:$4 sm:$0xff]  }
  0xb4   :  { %4004 = vmatprep.subr.bf16.mxu0 %v5570_v51  ;;  %v5658_v51 = vld [vmem:[%s8409_s1 + $0xce8] ss:$148 sps:$4 sm:$0xff]  }
  0xb6   :  { %4046 = vmatpush2.bf16.msra.mxu1 %v5604_v62 }
  0xb7   :  { %4005 = vmatpush2.bf16.msra.mxu0 %v5568_v52  ;;  %4047 = vmatprep.subr.bf16.mxu1 %v5612_v63  ;;  %v5690_v52 = vld [vmem:[%s8409_s1 + $0xf44] ss:$148 sps:$4 sm:$0xff]   ;;  %v5702_v63 = vld [vmem:[%s8409_s1 + $0xcf4] ss:$148 sps:$4 sm:$0xff]  }
  0xb8   :  { %4006 = vmatprep.subr.bf16.mxu0 %v5576_v55  ;;  %v5664_v55 = vld [vmem:[%s8409_s1 + $0xbc0] ss:$148 sps:$4 sm:$0xff]  }
  0xba   :  { %4048 = vmatpush2.bf16.msra.mxu1 %v5610_v2  ;;  %v5676_v2 = vld [vmem:[%s8409_s1 + $0x970] ss:$148 sps:$4 sm:$0xff]  }
  0xbb   :  { %4007 = vmatpush2.bf16.msra.mxu0 %v5574_v56  ;;  %4049 = vmatprep.subr.bf16.mxu1 %v5618_v3  ;;  %v635_v56 = vlaneseq  ;;  %v7014_v3 = vld [vmem:[%s8411_s2] sm:$0xff] }
  0xbc   :  { %4008 = vmatprep.subr.bf16.mxu0 %v5582_v59  ;;  %v5694_v59 = vld [vmem:[%s8409_s1 + $0xe18] ss:$148 sps:$4 sm:$0xff]  }
  0xbd   :  { %v6997_v62 = vshrl.u32 %v635_v56, 7  ;;  %v5726_v56 = vld [vmem:[%s8409_s1 + $0x44] ss:$148 sps:$4 sm:$0xff]  }
  0xbe   :  { %4050 = vmatpush2.bf16.msra.mxu1 %v5616_v6  ;;  %v5687_v6 = vld [vmem:[%s8409_s1 + $0x85c] ss:$148 sps:$4 sm:$0xff]  }
  0xbf   :  { %4009 = vmatpush2.bf16.msra.mxu0 %v5580_v60  ;;  %4051 = vmatprep.subr.bf16.mxu1 %v5624_v7  ;;  %v5670_v60 = vld [vmem:[%s8409_s1 + $0xa98] ss:$148 sps:$4 sm:$0xff]   ;;  %v5706_v7 = vld [vmem:[%s8409_s1 + $0xbc8] ss:$148 sps:$4 sm:$0xff]  }
  0xc0   :  { %4064 = vmatprep.subr.bf16.mxu0 %v5591_v0  ;;  %v5678_v0 = vld [vmem:[%s8409_s1 + $0x974] ss:$148 sps:$4 sm:$0xff]  }
  0xc2   :  { %4011 = vmatmul.mubr.bf16.vlgmr.msra.gmra.mxu0 %v6415_v61  ;;  %v5603_v61 = vld [vmem:[%s8409_s1 + $0x5fc] ss:$148 sps:$4 sm:$0xff]   ;;  %4052 = vmatpush2.bf16.msra.mxu1 %v5622_v10 }
  0xc3   :  { %4065 = vmatpush1.bf16.msra.mxu0 %v5589_v1  ;;  %4096 = vmatprep.mubr.bf16.mxu0 %v6837_v8  ;;  %v5700_v1 = vld [vmem:[%s8409_s1 + $0xcf0] ss:$148 sps:$4 sm:$0xff]  }
  0xc4   :  { %4066 = vmatprep.subr.bf16.mxu0 %v5597_v4  ;;  %4107 = vmatprep.subr.bf16.mxu1 %v5633_v11  ;;  %v7017_v4 = vsub.s32 0, %v6997_v62  ;;  %v5714_v11 = vld [vmem:[%s8409_s1 + $0xaa4] ss:$148 sps:$4 sm:$0xff]  }
  0xc5   :  { %4054 = vmatmul.mubr.bf16.vlgmr.msra.gmra.mxu1 %v6867_v17 }
  0xc6   :  { %4108 = vmatpush1.bf16.msra.mxu1 %v5631_v14  ;;  %4139 = vmatprep.mubr.bf16.mxu1 %v6837_v8  ;;  %v638_v10 = vrot.slane %v7014_v3, %v7017_v4  ;;  %v5691_v14 = vld [vmem:[%s8409_s1 + $0x730] ss:$148 sps:$4 sm:$0xff]  }
  0xc7   :  { %4067 = vmatpush1.bf16.msra.mxu0 %v5595_v5  ;;  %4109 = vmatprep.subr.bf16.mxu1 %v5639_v15  ;;  %v5708_v5 = vld [vmem:[%s8409_s1 + $0xbcc] ss:$148 sps:$4 sm:$0xff]  }
  0xc8   :  { %4068 = vmatprep.subr.bf16.mxu0 %v5603_v61  ;;  %v5685_v61 = vld [vmem:[%s8409_s1 + $0x858] ss:$148 sps:$4 sm:$0xff]   ;;  %v5712_v15 = vld [vmem:[%s8409_s1 + $0xaa0] ss:$148 sps:$4 sm:$0xff]  }
  0xca   :  { %4110 = vmatpush1.bf16.msra.mxu1 %v5637_v19 }
  0xcb   :  { %4069 = vmatpush1.bf16.msra.mxu0 %v5601_v9  ;;  %4111 = vmatprep.subr.bf16.mxu1 %v5645_v34  ;;  %v7032_v9 = vsub.s32 1, %v6997_v62 }
  0xcc   :  { %4070 = vmatprep.subr.bf16.mxu0 %v5609_v12  ;;  %v5693_v12 = vld [vmem:[%s8409_s1 + $0x734] ss:$148 sps:$4 sm:$0xff]  }
  0xce   :  { %4112 = vmatpush1.bf16.msra.mxu1 %v5643_v22  ;;  %v5697_v22 = vld [vmem:[%s8409_s1 + $0x608] ss:$148 sps:$4 sm:$0xff]  }
  0xcf   :  { %4071 = vmatpush1.bf16.msra.mxu0 %v5607_v13  ;;  %4113 = vmatprep.subr.bf16.mxu1 %v5651_v23  ;;  %v642_v13 = vrot.slane %v7014_v3, %v7032_v9  ;;  %v5718_v23 = vld [vmem:[%s8409_s1 + $0x978] ss:$148 sps:$4 sm:$0xff]  }
  0xd0   :  { %4072 = vmatprep.subr.bf16.mxu0 %v5615_v16  ;;  %v5720_v16 = vld [vmem:[%s8409_s1 + $0x97c] ss:$148 sps:$4 sm:$0xff]  }
  0xd2   :  { %4114 = vmatpush1.bf16.msra.mxu1 %v5649_v26  ;;  %v7071_v26 = vsub.s32 2, %v6997_v62 }
  0xd3   :  { %4073 = vmatpush1.bf16.msra.mxu0 %v5613_v18  ;;  %4115 = vmatprep.subr.bf16.mxu1 %v5657_v27 }
  0xd4   :  { %4074 = vmatprep.subr.bf16.mxu0 %v5621_v20  ;;  %v5699_v20 = vld [vmem:[%s8409_s1 + $0x60c] ss:$148 sps:$4 sm:$0xff]  }
  0xd6   :  { %4116 = vmatpush1.bf16.msra.mxu1 %v5655_v30  ;;  %v7080_v30 = vsub.s32 3, %v6997_v62 }
  0xd7   :  { %4075 = vmatpush1.bf16.msra.mxu0 %v5619_v21  ;;  %4117 = vmatprep.subr.bf16.mxu1 %v5663_v31 }
  0xd8   :  { %4076 = vmatprep.subr.bf16.mxu0 %v5627_v24  ;;  %v5729_v24 = vld [vmem:[%s8409_s1 + $0x864] ss:$148 sps:$4 sm:$0xff]  }
  0xda   :  { %4118 = vmatpush1.bf16.msra.mxu1 %v5661_v35  ;;  %v5703_v35 = vld [vmem:[%s8409_s1 + $0x4e0] ss:$148 sps:$4 sm:$0xff]  }
  0xdb   :  { %4077 = vmatpush1.bf16.msra.mxu0 %v5625_v25  ;;  %4119 = vmatprep.subr.bf16.mxu1 %v5669_v36  ;;  %v5711_v36 = vld [vmem:[%s8409_s1 + $0x3bc] ss:$148 sps:$4 sm:$0xff]  }
  0xdc   :  { %4078 = vmatprep.subr.bf16.mxu0 %v5630_v28 }
  0xde   :  { %4120 = vmatpush1.bf16.msra.mxu1 %v5667_v39  ;;  %v5733_v39 = vld [vmem:[%s8409_s1 + $0x738] ss:$148 sps:$4 sm:$0xff]  }
  0xdf   :  { %4079 = vmatpush1.bf16.msra.mxu0 %v5628_v29  ;;  %4121 = vmatprep.subr.bf16.mxu1 %v5675_v40  ;;  %v5705_v29 = vld [vmem:[%s8409_s1 + $0x4e4] ss:$148 sps:$4 sm:$0xff]  }
  0xe0   :  { %4080 = vmatprep.subr.bf16.mxu0 %v5636_v32  ;;  %v5727_v32 = vld [vmem:[%s8409_s1 + $0x860] ss:$148 sps:$4 sm:$0xff]  }
  0xe2   :  { %4122 = vmatpush1.bf16.msra.mxu1 %v5673_v43  ;;  %v5717_v43 = vld [vmem:[%s8409_s1 + $0x294] ss:$148 sps:$4 sm:$0xff]  }
  0xe3   :  { %4081 = vmatpush2.bf16.msra.mxu0 %v5634_v33  ;;  %4123 = vmatprep.subr.bf16.mxu1 %v5681_v44  ;;  %v646_v33 = vrot.slane %v7014_v3, %v7071_v26 }
  0xe4   :  { %4082 = vmatprep.subr.bf16.mxu0 %v5642_v37  ;;  %v5735_v37 = vld [vmem:[%s8409_s1 + $0x73c] ss:$148 sps:$4 sm:$0xff]  }
  0xe6   :  { %4124 = vmatpush2.bf16.msra.mxu1 %v5679_v47 }
  0xe7   :  { %4083 = vmatpush2.bf16.msra.mxu0 %v5640_v38  ;;  %4125 = vmatprep.subr.bf16.mxu1 %v5684_v48  ;;  %v650_v38 = vrot.slane %v7014_v3, %v7080_v30 }
  0xe8   :  { %4084 = vmatprep.subr.bf16.mxu0 %v5648_v41 }
  0xea   :  { %4126 = vmatpush2.bf16.msra.mxu1 %v5682_v50  ;;  %v5723_v50 = vld [vmem:[%s8409_s1 + $0x16c] ss:$148 sps:$4 sm:$0xff]  }
  0xeb   :  { %4085 = vmatpush2.bf16.msra.mxu0 %v5646_v42  ;;  %4127 = vmatprep.subr.bf16.mxu1 %v5690_v52  ;;  %v5709_v42 = vld [vmem:[%s8409_s1 + $0x3b8] ss:$148 sps:$4 sm:$0xff]  }
  0xec   :  { %4086 = vmatprep.subr.bf16.mxu0 %v5654_v45  ;;  %v5741_v45 = vld [vmem:[%s8409_s1 + $0x614] ss:$148 sps:$4 sm:$0xff]   ;;  %v5747_v52 = vld [vmem:[%s8409_s1 + $0x4ec] ss:$148 sps:$4 sm:$0xff]  }
  0xee   :  { %4128 = vmatpush2.bf16.msra.mxu1 %v5688_v54  ;;  %v5745_v54 = vld [vmem:[%s8409_s1 + $0x4e8] ss:$148 sps:$4 sm:$0xff]  }
  0xef   :  { %4087 = vmatpush2.bf16.msra.mxu0 %v5652_v46  ;;  %4129 = vmatprep.subr.bf16.mxu1 %v5696_v57  ;;  %v5739_v46 = vld [vmem:[%s8409_s1 + $0x610] ss:$148 sps:$4 sm:$0xff]  }
  0xf0   :  { %4088 = vmatprep.subr.bf16.mxu0 %v5660_v49  ;;  %v5715_v49 = vld [vmem:[%s8409_s1 + $0x290] ss:$148 sps:$4 sm:$0xff]  }
  0xf1   :  { %v5753_v57 = vld [vmem:[%s8409_s1 + $0x3c4] ss:$148 sps:$4 sm:$0xff]  }
  0xf2   :  { %4130 = vmatpush2.bf16.msra.mxu1 %v5694_v59  ;;  %v5724_v59 = vld [vmem:[%s8409_s1 + $0x40] ss:$148 sps:$4 sm:$0xff]  }
  0xf3   :  { %4089 = vmatpush2.bf16.msra.mxu0 %v5658_v51  ;;  %4131 = vmatprep.subr.bf16.mxu1 %v5702_v63  ;;  %v5732_v63 = vld [vmem:[%s8409_s1 + $0x119c] ss:$148 sps:$4 sm:$0xff]  }
  0xf4   :  { %4090 = vmatprep.subr.bf16.mxu0 %v5666_v53 }
  0xf6   :  { %4132 = vmatpush2.bf16.msra.mxu1 %v5700_v1  ;;  %v5730_v1 = vld [vmem:[%s8409_s1 + $0x1198] ss:$148 sps:$4 sm:$0xff]  }
  0xf7   :  { %4091 = vmatpush2.bf16.msra.mxu0 %v5664_v55  ;;  %4133 = vmatprep.subr.bf16.mxu1 %v5708_v5  ;;  %v5721_v55 = vld [vmem:[%s8409_s1 + $0x168] ss:$148 sps:$4 sm:$0xff]  }
  0xf8   :  { %4092 = vmatprep.subr.bf16.mxu0 %v5672_v58  ;;  %v5751_v58 = vld [vmem:[%s8409_s1 + $0x3c0] ss:$148 sps:$4 sm:$0xff]  }
  0xf9   :  { %v5738_v5 = vld [vmem:[%s8409_s1 + $0x1074] ss:$148 sps:$4 sm:$0xff]  }
  0xfa   :  { %4134 = vmatpush2.bf16.msra.mxu1 %v5706_v7  ;;  %v5736_v7 = vld [vmem:[%s8409_s1 + $0x1070] ss:$148 sps:$4 sm:$0xff]  }
  0xfb   :  { %4093 = vmatpush2.bf16.msra.mxu0 %v5670_v60  ;;  %4135 = vmatprep.subr.bf16.mxu1 %v5714_v11  ;;  %v5759_v60 = vld [vmem:[%s8409_s1 + $0x29c] ss:$148 sps:$4 sm:$0xff]  }
  0xfc   :  { %4094 = vmatprep.subr.bf16.mxu0 %v5678_v0  ;;  %v5757_v0 = vld [vmem:[%s8409_s1 + $0x298] ss:$148 sps:$4 sm:$0xff]   ;;  %v5769_v11 = vld [vmem:[%s8409_s1 + $0x48] ss:$148 sps:$4 sm:$0xff]  }
  0xfe   :  { %4136 = vmatpush2.bf16.msra.mxu1 %v5712_v15  ;;  %v5775_v15 = vld [vmem:[%s8409_s1 + $0x11a0] ss:$148 sps:$4 sm:$0xff]  }
  0xff   :  { %4095 = vmatpush2.bf16.msra.mxu0 %v5676_v2  ;;  %4137 = vmatprep.subr.bf16.mxu1 %v5720_v16  ;;  %v5765_v2 = vld [vmem:[%s8409_s1 + $0x174] ss:$148 sps:$4 sm:$0xff]  }
 0x100   :  { %4150 = vmatprep.subr.bf16.mxu0 %v5687_v6  ;;  %v5763_v6 = vld [vmem:[%s8409_s1 + $0x170] ss:$148 sps:$4 sm:$0xff]   ;;  %v5748_v16 = vld [vmem:[%s8409_s1 + $0xe20] ss:$148 sps:$4 sm:$0xff]  }
 0x102   :  { %v3840_v18 = vpop.f32.mrf.mxu0  ;;  %4097 = vmatmul.mubr.bf16.vlgmr.msra.gmra.mxu0 %v6867_v17  ;;  %4138 = vmatpush2.bf16.msra.mxu1 %v5718_v23  ;;  %v5784_v23 = vld [vmem:[%s8409_s1 + $0xf50] ss:$148 sps:$4 sm:$0xff]  }
 0x103   :  { %v3841_v19 = vadd.f32 %v3840_v18, %v638_v10  ;;  %4151 = vmatpush1.bf16.msra.mxu0 %v5685_v61  ;;  %4182 = vmatprep.mubr.bf16.mxu0 %v6837_v8  ;;  %v5771_v61 = vld [vmem:[%s8409_s1 + $0x4c] ss:$148 sps:$4 sm:$0xff]   ;;  %v5780_v18 = vld [vmem:[%s8409_s1 + $0x107c] ss:$148 sps:$4 sm:$0xff]  }
 0x104   :  { %v3842_v34 = vpop.f32.mrf.mxu0  ;;  %4152 = vmatprep.subr.bf16.mxu0 %v5693_v12  ;;  %4193 = vmatprep.subr.bf16.mxu1 %v5729_v24  ;;  %v5742_v12 = vld [vmem:[%s8409_s1 + $0xf48] ss:$148 sps:$4 sm:$0xff]   ;;  %v5760_v24 = vld [vmem:[%s8409_s1 + $0xbd0] ss:$148 sps:$4 sm:$0xff]  }
 0x105   :  { %4621 = vst [vmem:[%s8412_s3] sm:$0xff] %v3841_v19  ;;  %v3843_v21 = vadd.f32 %v3842_v34, %v642_v13  ;;  %v3883_v40 = vpop.f32.mrf.mxu1  ;;  %4140 = vmatmul.mubr.bf16.vlgmr.msra.gmra.mxu1 %v6867_v17  ;;  %v5756_v19 = vld [vmem:[%s8409_s1 + $0xcfc] ss:$148 sps:$4 sm:$0xff]   ;;  %v5778_v34 = vld [vmem:[%s8409_s1 + $0x1078] ss:$148 sps:$4 sm:$0xff]  }
 0x106   :  { %v3844_v25 = vpop.f32.mrf.mxu0  ;;  %v3884_v41 = vadd.f32 %v3883_v40, %v646_v33  ;;  %4194 = vmatpush1.bf16.msra.mxu1 %v5727_v32  ;;  %4225 = vmatprep.mubr.bf16.mxu1 %v6837_v8  ;;  %v5774_v32 = vld [vmem:[%s8409_s1 + $0x984] ss:$148 sps:$4 sm:$0xff]   ;;  %v5781_v40 = vld [vmem:[%s8409_s1 + $0x868] ss:$148 sps:$4 sm:$0xff]  }
 0x107   :  { %4622 = vst [vmem:[%s8412_s3 + $0x8] sm:$0xff] %v3843_v21  ;;  %v3845_v27 = vadd.f32 %v3844_v25, %v638_v10  ;;  %4153 = vmatpush1.bf16.msra.mxu0 %v5691_v14  ;;  %v3885_v44 = vpop.f32.mrf.mxu1  ;;  %4195 = vmatprep.subr.bf16.mxu1 %v5735_v37  ;;  %v5744_v10 = vld [vmem:[%s8409_s1 + $0xf4c] ss:$148 sps:$4 sm:$0xff]   ;;  %v5750_v14 = vld [vmem:[%s8409_s1 + $0xe24] ss:$148 sps:$4 sm:$0xff]  }
 0x108   :  { %v3846_v28 = vpop.f32.mrf.mxu0  ;;  %4154 = vmatprep.subr.bf16.mxu0 %v5699_v20  ;;  %4623 = vst [vmem:[%s8412_s3 + $0x10] sm:$0xff] %v3884_v41  ;;  %v3886_v8 = vadd.f32 %v3885_v44, %v650_v38  ;;  %v5754_v20 = vld [vmem:[%s8409_s1 + $0xcf8] ss:$148 sps:$4 sm:$0xff]   ;;  %v5786_v21 = vld [vmem:[%s8409_s1 + $0xf54] ss:$148 sps:$4 sm:$0xff]   ;;  %v7272_v41 = vsub.s32 5, %v6997_v62 }
 0x109   :  { %4659 = vst [vmem:[%s8412_s3 + $0x128] sm:$0xff] %v3845_v27  ;;  %v3847_v31 = vadd.f32 %v3846_v28, %v642_v13  ;;  %v3887_v47 = vpop.f32.mrf.mxu1  ;;  %v5777_v13 = vld [vmem:[%s8409_s1 + $0x11a4] ss:$148 sps:$4 sm:$0xff]   ;;  %v5792_v25 = vld [vmem:[%s8409_s1 + $0xe2c] ss:$148 sps:$4 sm:$0xff]  }
 0x10a   :  { %4624 = vst [vmem:[%s8412_s3 + $0x18] sm:$0xff] %v3886_v8  ;;  %v3888_v48 = vadd.f32 %v3887_v47, %v646_v33  ;;  %4196 = vmatpush1.bf16.msra.mxu1 %v5733_v39  ;;  %v5768_v27 = vld [vmem:[%s8409_s1 + $0xaac] ss:$148 sps:$4 sm:$0xff]   ;;  %v5790_v28 = vld [vmem:[%s8409_s1 + $0xe28] ss:$148 sps:$4 sm:$0xff]  }
 0x10b   :  { %4660 = vst [vmem:[%s8412_s3 + $0x130] sm:$0xff] %v3847_v31  ;;  %4155 = vmatpush1.bf16.msra.mxu0 %v5697_v22  ;;  %v3889_v51 = vpop.f32.mrf.mxu1  ;;  %4197 = vmatprep.subr.bf16.mxu1 %v5741_v45  ;;  %v5762_v22 = vld [vmem:[%s8409_s1 + $0xbd4] ss:$148 sps:$4 sm:$0xff]   ;;  %v5798_v31 = vld [vmem:[%s8409_s1 + $0xd04] ss:$148 sps:$4 sm:$0xff]   ;;  %v658_v45 = vrot.slane %v7014_v3, %v7272_v41 }
 0x10c   :  { %4156 = vmatprep.subr.bf16.mxu0 %v5705_v29  ;;  %4661 = vst [vmem:[%s8412_s3 + $0x138] sm:$0xff] %v3888_v48  ;;  %v3890_v53 = vadd.f32 %v3889_v51, %v650_v38  ;;  %v5766_v29 = vld [vmem:[%s8409_s1 + $0xaa8] ss:$148 sps:$4 sm:$0xff]   ;;  %v5796_v33 = vld [vmem:[%s8409_s1 + $0xd00] ss:$148 sps:$4 sm:$0xff]  }
 0x10d   :  { %v5804_v37 = vld [vmem:[%s8409_s1 + $0xbdc] ss:$148 sps:$4 sm:$0xff]   ;;  %v5783_v38 = vld [vmem:[%s8409_s1 + $0x86c] ss:$148 sps:$4 sm:$0xff]   ;;  %v5789_v44 = vld [vmem:[%s8409_s1 + $0x744] ss:$148 sps:$4 sm:$0xff]  }
 0x10e   :  { %4662 = vst [vmem:[%s8412_s3 + $0x140] sm:$0xff] %v3890_v53  ;;  %4198 = vmatpush1.bf16.msra.mxu1 %v5739_v46  ;;  %v5802_v39 = vld [vmem:[%s8409_s1 + $0xbd8] ss:$148 sps:$4 sm:$0xff]   ;;  %v5787_v8 = vld [vmem:[%s8409_s1 + $0x740] ss:$148 sps:$4 sm:$0xff]  }
 0x10f   :  { %4157 = vmatpush1.bf16.msra.mxu0 %v5703_v35  ;;  %4199 = vmatprep.subr.bf16.mxu1 %v5747_v52  ;;  %v5772_v35 = vld [vmem:[%s8409_s1 + $0x980] ss:$148 sps:$4 sm:$0xff]   ;;  %v5808_v46 = vld [vmem:[%s8409_s1 + $0xab0] ss:$148 sps:$4 sm:$0xff]   ;;  %v5793_v53 = vld [vmem:[%s8409_s1 + $0x618] ss:$148 sps:$4 sm:$0xff]  }
 0x110   :  { %4158 = vmatprep.subr.bf16.mxu0 %v5711_v36  ;;  %v7257_v36 = vsub.s32 4, %v6997_v62  ;;  %v5816_v47 = vld [vmem:[%s8409_s1 + $0x98c] ss:$148 sps:$4 sm:$0xff]   ;;  %v5795_v51 = vld [vmem:[%s8409_s1 + $0x61c] ss:$148 sps:$4 sm:$0xff]  }
 0x111   :  { %v7300_v52 = vld [vmem:[%s8410_s0 + $0x4] ss:$8 sps:$4 sm:$0xff]  }
 0x112   :  { %4200 = vmatpush1.bf16.msra.mxu1 %v5745_v54  ;;  %v5814_v54 = vld [vmem:[%s8409_s1 + $0x988] ss:$148 sps:$4 sm:$0xff]  }
 0x113   :  { %4159 = vmatpush1.bf16.msra.mxu0 %v5709_v42  ;;  %4201 = vmatprep.subr.bf16.mxu1 %v5753_v57  ;;  %v5810_v42 = vld [vmem:[%s8409_s1 + $0xab4] ss:$148 sps:$4 sm:$0xff]   ;;  %v7316_v57 = vsub.s32 6, %v6997_v62 }
 0x114   :  { %4160 = vmatprep.subr.bf16.mxu0 %v5717_v43  ;;  %v654_v43 = vrot.slane %v7014_v3, %v7257_v36 }
 0x116   :  { %4202 = vmatpush1.bf16.msra.mxu1 %v5751_v58 }
 0x117   :  { %4161 = vmatpush1.bf16.msra.mxu0 %v5715_v49  ;;  %4203 = vmatprep.subr.bf16.mxu1 %v5759_v60  ;;  %v5801_v60 = vld [vmem:[%s8409_s1 + $0x4f4] ss:$148 sps:$4 sm:$0xff]  }
 0x118   :  { %4162 = vmatprep.subr.bf16.mxu0 %v5723_v50 }
 0x11a   :  { %4204 = vmatpush1.bf16.msra.mxu1 %v5757_v0 }
 0x11b   :  { %4163 = vmatpush1.bf16.msra.mxu0 %v5721_v55  ;;  %4205 = vmatprep.subr.bf16.mxu1 %v5765_v2  ;;  %v5825_v55 = vld [vmem:[%s8409_s1 + $0x874] ss:$148 sps:$4 sm:$0xff]   ;;  %v662_v2 = vrot.slane %v7014_v3, %v7316_v57 }
 0x11c   :  { %4164 = vmatprep.subr.bf16.mxu0 %v5726_v56 }
 0x11e   :  { %4206 = vmatpush1.bf16.msra.mxu1 %v5763_v6  ;;  %v5831_v6 = vld [vmem:[%s8409_s1 + $0x74c] ss:$148 sps:$4 sm:$0xff]  }
 0x11f   :  { %4165 = vmatpush1.bf16.msra.mxu0 %v5724_v59  ;;  %4207 = vmatprep.subr.bf16.mxu1 %v5771_v61  ;;  %v5829_v61 = vld [vmem:[%s8409_s1 + $0x748] ss:$148 sps:$4 sm:$0xff]  }
 0x120   :  { %4166 = vmatprep.subr.bf16.mxu0 %v5732_v63  ;;  %v7325_v63 = vsub.s32 7, %v6997_v62  ;;  %v5799_v62 = vld [vmem:[%s8409_s1 + $0x4f0] ss:$148 sps:$4 sm:$0xff]  }
 0x122   :  { %4208 = vmatpush1.bf16.msra.mxu1 %v5769_v11  ;;  %v7355_v11 = vld [vmem:[%s8410_s0] ss:$8 sps:$4 sm:$0xff]  }
 0x123   :  { %4167 = vmatpush2.bf16.msra.mxu0 %v5730_v1  ;;  %4209 = vmatprep.subr.bf16.mxu1 %v5777_v13  ;;  %v5823_v1 = vld [vmem:[%s8409_s1 + $0x870] ss:$148 sps:$4 sm:$0xff]  }
 0x124   :  { %4168 = vmatprep.subr.bf16.mxu0 %v5738_v5  ;;  %v5807_v5 = vld [vmem:[%s8409_s1 + $0x3cc] ss:$148 sps:$4 sm:$0xff]   ;;  %v5813_v13 = vld [vmem:[%s8409_s1 + $0x2a4] ss:$148 sps:$4 sm:$0xff]  }
 0x126   :  { %4210 = vmatpush2.bf16.msra.mxu1 %v5775_v15  ;;  %v5837_v15 = vld [vmem:[%s8409_s1 + $0x624] ss:$148 sps:$4 sm:$0xff]  }
 0x127   :  { %4169 = vmatpush2.bf16.msra.mxu0 %v5736_v7  ;;  %4211 = vmatprep.subr.bf16.mxu1 %v5780_v18  ;;  %v666_v7 = vrot.slane %v7014_v3, %v7325_v63  ;;  %v5805_v3 = vld [vmem:[%s8409_s1 + $0x3c8] ss:$148 sps:$4 sm:$0xff]   ;;  %v5835_v18 = vld [vmem:[%s8409_s1 + $0x620] ss:$148 sps:$4 sm:$0xff]  }
 0x128   :  { %4170 = vmatprep.subr.bf16.mxu0 %v5744_v10 }
 0x12a   :  { %4212 = vmatpush2.bf16.msra.mxu1 %v5778_v34 }
 0x12b   :  { %4171 = vmatpush2.bf16.msra.mxu0 %v5742_v12  ;;  %4213 = vmatprep.subr.bf16.mxu1 %v5786_v21  ;;  %v5819_v21 = vld [vmem:[%s8409_s1 + $0x17c] ss:$148 sps:$4 sm:$0xff]  }
 0x12c   :  { %4172 = vmatprep.subr.bf16.mxu0 %v5750_v14 }
 0x12e   :  { %4214 = vmatpush2.bf16.msra.mxu1 %v5784_v23  ;;  %v5843_v23 = vld [vmem:[%s8409_s1 + $0x4fc] ss:$148 sps:$4 sm:$0xff]  }
 0x12f   :  { %4173 = vmatpush2.bf16.msra.mxu0 %v5748_v16  ;;  %4215 = vmatprep.subr.bf16.mxu1 %v5792_v25  ;;  %v5841_v25 = vld [vmem:[%s8409_s1 + $0x4f8] ss:$148 sps:$4 sm:$0xff]  }
 0x130   :  { %4174 = vmatprep.subr.bf16.mxu0 %v5756_v19 }
 0x132   :  { %4216 = vmatpush2.bf16.msra.mxu1 %v5790_v28  ;;  %v5822_v28 = vld [vmem:[%s8409_s1 + $0x54] ss:$148 sps:$4 sm:$0xff]  }
 0x133   :  { %4175 = vmatpush2.bf16.msra.mxu0 %v5754_v20  ;;  %4217 = vmatprep.subr.bf16.mxu1 %v5798_v31  ;;  %v5811_v20 = vld [vmem:[%s8409_s1 + $0x2a0] ss:$148 sps:$4 sm:$0xff]   ;;  %v5847_v31 = vld [vmem:[%s8409_s1 + $0x3d0] ss:$148 sps:$4 sm:$0xff]  }
 0x134   :  { %4176 = vmatprep.subr.bf16.mxu0 %v5762_v22 }
 0x136   :  { %4218 = vmatpush2.bf16.msra.mxu1 %v5796_v33  ;;  %v5855_v33 = vld [vmem:[%s8409_s1 + $0x2ac] ss:$148 sps:$4 sm:$0xff]  }
 0x137   :  { %4177 = vmatpush2.bf16.msra.mxu0 %v5760_v24  ;;  %4219 = vmatprep.subr.bf16.mxu1 %v5804_v37  ;;  %v5853_v37 = vld [vmem:[%s8409_s1 + $0x2a8] ss:$148 sps:$4 sm:$0xff]  }
 0x138   :  { %4178 = vmatprep.subr.bf16.mxu0 %v5768_v27  ;;  %v5817_v27 = vld [vmem:[%s8409_s1 + $0x178] ss:$148 sps:$4 sm:$0xff]  }
 0x13a   :  { %4220 = vmatpush2.bf16.msra.mxu1 %v5802_v39  ;;  %v5861_v39 = vld [vmem:[%s8409_s1 + $0x184] ss:$148 sps:$4 sm:$0xff]  }
 0x13b   :  { %4179 = vmatpush2.bf16.msra.mxu0 %v5766_v29  ;;  %4221 = vmatprep.subr.bf16.mxu1 %v5810_v42  ;;  %v5849_v29 = vld [vmem:[%s8409_s1 + $0x3d4] ss:$148 sps:$4 sm:$0xff]  }
 0x13c   :  { %4180 = vmatprep.subr.bf16.mxu0 %v5774_v32  ;;  %v5820_v32 = vld [vmem:[%s8409_s1 + $0x50] ss:$148 sps:$4 sm:$0xff]   ;;  %v5859_v42 = vld [vmem:[%s8409_s1 + $0x180] ss:$148 sps:$4 sm:$0xff]  }
 0x13e   :  { %4222 = vmatpush2.bf16.msra.mxu1 %v5808_v46  ;;  %v5838_v46 = vld [vmem:[%s8409_s1 + $0xf58] ss:$148 sps:$4 sm:$0xff]  }
 0x13f   :  { %4181 = vmatpush2.bf16.msra.mxu0 %v5772_v35  ;;  %4223 = vmatprep.subr.bf16.mxu1 %v5816_v47  ;;  %v5828_v35 = vld [vmem:[%s8409_s1 + $0x11ac] ss:$148 sps:$4 sm:$0xff]   ;;  %v5873_v47 = vld [vmem:[%s8409_s1 + $0x11b4] ss:$148 sps:$4 sm:$0xff]  }
 0x140   :  { %4236 = vmatprep.subr.bf16.mxu0 %v5783_v38  ;;  %v5826_v38 = vld [vmem:[%s8409_s1 + $0x11a8] ss:$148 sps:$4 sm:$0xff]  }
 0x142   :  { %v3926_v48 = vpop.f32.mrf.mxu0  ;;  %4183 = vmatmul.mubr.bf16.vlgmr.msra.gmra.mxu0 %v6867_v17  ;;  %4224 = vmatpush2.bf16.msra.mxu1 %v5814_v54  ;;  %v5850_v54 = vld [vmem:[%s8409_s1 + $0xd08] ss:$148 sps:$4 sm:$0xff]  }
 0x143   :  { %v3927_v49 = vadd.f32 %v3926_v48, %v654_v43  ;;  %4237 = vmatpush1.bf16.msra.mxu0 %v5781_v40  ;;  %4268 = vmatprep.mubr.bf16.mxu0 %v7300_v52  ;;  %v5834_v40 = vld [vmem:[%s8409_s1 + $0x1084] ss:$148 sps:$4 sm:$0xff]   ;;  %v5846_v48 = vld [vmem:[%s8409_s1 + $0xe34] ss:$148 sps:$4 sm:$0xff]  }
 0x144   :  { %v3928_v50 = vpop.f32.mrf.mxu0  ;;  %4238 = vmatprep.subr.bf16.mxu0 %v5789_v44  ;;  %4279 = vmatprep.subr.bf16.mxu1 %v5825_v55  ;;  %v5867_v44 = vld [vmem:[%s8409_s1 + $0x5c] ss:$148 sps:$4 sm:$0xff]   ;;  %v5882_v55 = vld [vmem:[%s8409_s1 + $0xf64] ss:$148 sps:$4 sm:$0xff]  }
 0x145   :  { %4625 = vst [vmem:[%s8412_s3 + $0x20] sm:$0xff] %v3927_v49  ;;  %v3929_v17 = vadd.f32 %v3928_v50, %v658_v45  ;;  %v3969_v10 = vpop.f32.mrf.mxu1  ;;  %4226 = vmatmul.mubr.bf16.vlgmr.msra.gmra.mxu1 %v7355_v11  ;;  %v5871_v49 = vld [vmem:[%s8409_s1 + $0x11b0] ss:$148 sps:$4 sm:$0xff]  }
 0x146   :  { %v3930_v56 = vpop.f32.mrf.mxu0  ;;  %v3970_v12 = vadd.f32 %v3969_v10, %v662_v2  ;;  %4280 = vmatpush1.bf16.msra.mxu1 %v5823_v1  ;;  %4311 = vmatprep.mubr.bf16.mxu1 %v7300_v52  ;;  %v5844_v50 = vld [vmem:[%s8409_s1 + $0xe30] ss:$148 sps:$4 sm:$0xff]   ;;  %v5886_v1 = vld [vmem:[%s8409_s1 + $0xe38] ss:$148 sps:$4 sm:$0xff]  }
 0x147   :  { %4626 = vst [vmem:[%s8412_s3 + $0x28] sm:$0xff] %v3929_v17  ;;  %v3931_v58 = vadd.f32 %v3930_v56, %v654_v43  ;;  %4239 = vmatpush1.bf16.msra.mxu0 %v5787_v8  ;;  %v3971_v14 = vpop.f32.mrf.mxu1  ;;  %4281 = vmatprep.subr.bf16.mxu1 %v5831_v6  ;;  %v5832_v43 = vld [vmem:[%s8409_s1 + $0x1080] ss:$148 sps:$4 sm:$0xff]   ;;  %v5865_v8 = vld [vmem:[%s8409_s1 + $0x58] ss:$148 sps:$4 sm:$0xff]  }
 0x148   :  { %v3932_v59 = vpop.f32.mrf.mxu0  ;;  %4240 = vmatprep.subr.bf16.mxu0 %v5795_v51  ;;  %4627 = vst [vmem:[%s8412_s3 + $0x30] sm:$0xff] %v3970_v12  ;;  %v3972_v16 = vadd.f32 %v3971_v14, %v666_v7  ;;  %v5876_v51 = vld [vmem:[%s8409_s1 + $0x108c] ss:$148 sps:$4 sm:$0xff]   ;;  %v5858_v56 = vld [vmem:[%s8409_s1 + $0xbe4] ss:$148 sps:$4 sm:$0xff]  }
 0x149   :  { %4663 = vst [vmem:[%s8412_s3 + $0x148] sm:$0xff] %v3931_v58  ;;  %v3933_v0 = vadd.f32 %v3932_v59, %v658_v45  ;;  %v3973_v19 = vpop.f32.mrf.mxu1  ;;  %v5840_v45 = vld [vmem:[%s8409_s1 + $0xf5c] ss:$148 sps:$4 sm:$0xff]   ;;  %v5852_v17 = vld [vmem:[%s8409_s1 + $0xd0c] ss:$148 sps:$4 sm:$0xff]  }
 0x14a   :  { %4628 = vst [vmem:[%s8412_s3 + $0x38] sm:$0xff] %v3972_v16  ;;  %v3974_v34 = vadd.f32 %v3973_v19, %v662_v2  ;;  %4282 = vmatpush1.bf16.msra.mxu1 %v5829_v61  ;;  %v5880_v58 = vld [vmem:[%s8409_s1 + $0xf60] ss:$148 sps:$4 sm:$0xff]   ;;  %v5862_v2 = vld [vmem:[%s8409_s1 + $0xab8] ss:$148 sps:$4 sm:$0xff]  }
 0x14b   :  { %4664 = vst [vmem:[%s8412_s3 + $0x150] sm:$0xff] %v3933_v0  ;;  %4241 = vmatpush1.bf16.msra.mxu0 %v5793_v53  ;;  %v3975_v22 = vpop.f32.mrf.mxu1  ;;  %4283 = vmatprep.subr.bf16.mxu1 %v5837_v15  ;;  %v5874_v53 = vld [vmem:[%s8409_s1 + $0x1088] ss:$148 sps:$4 sm:$0xff]   ;;  %v5856_v59 = vld [vmem:[%s8409_s1 + $0xbe0] ss:$148 sps:$4 sm:$0xff]  }
 0x14c   :  { %4242 = vmatprep.subr.bf16.mxu0 %v5801_v60  ;;  %4665 = vst [vmem:[%s8412_s3 + $0x158] sm:$0xff] %v3974_v34  ;;  %v3976_v24 = vadd.f32 %v3975_v22, %v666_v7  ;;  %v5888_v60 = vld [vmem:[%s8409_s1 + $0xe3c] ss:$148 sps:$4 sm:$0xff]   ;;  %v5900_v61 = vld [vmem:[%s8409_s1 + $0xbec] ss:$148 sps:$4 sm:$0xff]  }
 0x14d   :  { %v5864_v0 = vld [vmem:[%s8409_s1 + $0xabc] ss:$148 sps:$4 sm:$0xff]   ;;  %v7512_v10 = vld [vmem:[%s8411_s2 + $0x8] sm:$0xff]  ;;  %v5906_v15 = vld [vmem:[%s8409_s1 + $0xac4] ss:$148 sps:$4 sm:$0xff]  }
 0x14e   :  { %4666 = vst [vmem:[%s8412_s3 + $0x160] sm:$0xff] %v3976_v24  ;;  %4284 = vmatpush1.bf16.msra.mxu1 %v5835_v18  ;;  %v5892_v6 = vld [vmem:[%s8409_s1 + $0xd10] ss:$148 sps:$4 sm:$0xff]   ;;  %v5877_v14 = vld [vmem:[%s8409_s1 + $0x878] ss:$148 sps:$4 sm:$0xff]   ;;  %v674_v18 = vrot.slane %v7512_v10, %v7032_v9 }
 0x14f   :  { %4243 = vmatpush1.bf16.msra.mxu0 %v5799_v62  ;;  %4285 = vmatprep.subr.bf16.mxu1 %v5843_v23  ;;  %v5894_v62 = vld [vmem:[%s8409_s1 + $0xd14] ss:$148 sps:$4 sm:$0xff]   ;;  %v5868_v7 = vld [vmem:[%s8409_s1 + $0x990] ss:$148 sps:$4 sm:$0xff]   ;;  %v5891_v24 = vld [vmem:[%s8409_s1 + $0x62c] ss:$148 sps:$4 sm:$0xff]  }
 0x150   :  { %4244 = vmatprep.subr.bf16.mxu0 %v5807_v5  ;;  %v5870_v5 = vld [vmem:[%s8409_s1 + $0x994] ss:$148 sps:$4 sm:$0xff]   ;;  %v5879_v12 = vld [vmem:[%s8409_s1 + $0x87c] ss:$148 sps:$4 sm:$0xff]  }
 0x151   :  { %v5885_v16 = vld [vmem:[%s8409_s1 + $0x754] ss:$148 sps:$4 sm:$0xff]   ;;  %v5912_v22 = vld [vmem:[%s8409_s1 + $0x99c] ss:$148 sps:$4 sm:$0xff]  }
 0x152   :  { %4286 = vmatpush1.bf16.msra.mxu1 %v5841_v25  ;;  %v5904_v34 = vld [vmem:[%s8409_s1 + $0xac0] ss:$148 sps:$4 sm:$0xff]  }
 0x153   :  { %4245 = vmatpush1.bf16.msra.mxu0 %v5805_v3  ;;  %4287 = vmatprep.subr.bf16.mxu1 %v5849_v29  ;;  %v5898_v3 = vld [vmem:[%s8409_s1 + $0xbe8] ss:$148 sps:$4 sm:$0xff]  }
 0x154   :  { %4246 = vmatprep.subr.bf16.mxu0 %v5813_v13  ;;  %v670_v13 = vrot.slane %v7512_v10, %v7017_v4 }
 0x156   :  { %4288 = vmatpush1.bf16.msra.mxu1 %v5847_v31  ;;  %v5889_v31 = vld [vmem:[%s8409_s1 + $0x628] ss:$148 sps:$4 sm:$0xff]  }
 0x157   :  { %4247 = vmatpush1.bf16.msra.mxu0 %v5811_v20  ;;  %4289 = vmatprep.subr.bf16.mxu1 %v5855_v33 }
 0x158   :  { %4248 = vmatprep.subr.bf16.mxu0 %v5819_v21  ;;  %v5883_v21 = vld [vmem:[%s8409_s1 + $0x750] ss:$148 sps:$4 sm:$0xff]  }
 0x15a   :  { %4290 = vmatpush1.bf16.msra.mxu1 %v5853_v37 }
 0x15b   :  { %4249 = vmatpush1.bf16.msra.mxu0 %v5817_v27  ;;  %4291 = vmatprep.subr.bf16.mxu1 %v5861_v39  ;;  %v678_v39 = vrot.slane %v7512_v10, %v7071_v26 }
 0x15c   :  { %4250 = vmatprep.subr.bf16.mxu0 %v5822_v28  ;;  %v5910_v28 = vld [vmem:[%s8409_s1 + $0x998] ss:$148 sps:$4 sm:$0xff]  }
 0x15e   :  { %4292 = vmatpush1.bf16.msra.mxu1 %v5859_v42  ;;  %v5927_v42 = vld [vmem:[%s8409_s1 + $0x75c] ss:$148 sps:$4 sm:$0xff]  }
 0x15f   :  { %4251 = vmatpush1.bf16.msra.mxu0 %v5820_v32  ;;  %4293 = vmatprep.subr.bf16.mxu1 %v5867_v44  ;;  %v5921_v32 = vld [vmem:[%s8409_s1 + $0x884] ss:$148 sps:$4 sm:$0xff]   ;;  %v682_v44 = vrot.slane %v7512_v10, %v7080_v30 }
 0x160   :  { %4252 = vmatprep.subr.bf16.mxu0 %v5828_v35  ;;  %v5897_v35 = vld [vmem:[%s8409_s1 + $0x504] ss:$148 sps:$4 sm:$0xff]  }
 0x162   :  { %4294 = vmatpush1.bf16.msra.mxu1 %v5865_v8 }
 0x163   :  { %4253 = vmatpush2.bf16.msra.mxu0 %v5826_v38  ;;  %4295 = vmatprep.subr.bf16.mxu1 %v5873_v47  ;;  %v5919_v38 = vld [vmem:[%s8409_s1 + $0x880] ss:$148 sps:$4 sm:$0xff]   ;;  %v5901_v47 = vld [vmem:[%s8409_s1 + $0x3d8] ss:$148 sps:$4 sm:$0xff]  }
 0x164   :  { %4254 = vmatprep.subr.bf16.mxu0 %v5834_v40  ;;  %v5895_v40 = vld [vmem:[%s8409_s1 + $0x500] ss:$148 sps:$4 sm:$0xff]  }
 0x166   :  { %4296 = vmatpush2.bf16.msra.mxu1 %v5871_v49  ;;  %v5933_v49 = vld [vmem:[%s8409_s1 + $0x634] ss:$148 sps:$4 sm:$0xff]  }
 0x167   :  { %4255 = vmatpush2.bf16.msra.mxu0 %v5832_v43  ;;  %4297 = vmatprep.subr.bf16.mxu1 %v5876_v51  ;;  %v5903_v43 = vld [vmem:[%s8409_s1 + $0x3dc] ss:$148 sps:$4 sm:$0xff]  }
 0x168   :  { %4256 = vmatprep.subr.bf16.mxu0 %v5840_v45 }
 0x16a   :  { %4298 = vmatpush2.bf16.msra.mxu1 %v5874_v53 }
 0x16b   :  { %4257 = vmatpush2.bf16.msra.mxu0 %v5838_v46  ;;  %4299 = vmatprep.subr.bf16.mxu1 %v5882_v55  ;;  %v5925_v46 = vld [vmem:[%s8409_s1 + $0x758] ss:$148 sps:$4 sm:$0xff]   ;;  %v5907_v55 = vld [vmem:[%s8409_s1 + $0x2b0] ss:$148 sps:$4 sm:$0xff]  }
 0x16c   :  { %4258 = vmatprep.subr.bf16.mxu0 %v5846_v48 }
 0x16e   :  { %4300 = vmatpush2.bf16.msra.mxu1 %v5880_v58  ;;  %v5939_v58 = vld [vmem:[%s8409_s1 + $0x50c] ss:$148 sps:$4 sm:$0xff]  }
 0x16f   :  { %4259 = vmatpush2.bf16.msra.mxu0 %v5844_v50  ;;  %4301 = vmatprep.subr.bf16.mxu1 %v5888_v60  ;;  %v5909_v50 = vld [vmem:[%s8409_s1 + $0x2b4] ss:$148 sps:$4 sm:$0xff]  }
 0x170   :  { %4260 = vmatprep.subr.bf16.mxu0 %v5852_v17 }
 0x172   :  { %4302 = vmatpush2.bf16.msra.mxu1 %v5886_v1  ;;  %v5913_v1 = vld [vmem:[%s8409_s1 + $0x188] ss:$148 sps:$4 sm:$0xff]  }
 0x173   :  { %4261 = vmatpush2.bf16.msra.mxu0 %v5850_v54  ;;  %4303 = vmatprep.subr.bf16.mxu1 %v5894_v62  ;;  %v5931_v54 = vld [vmem:[%s8409_s1 + $0x630] ss:$148 sps:$4 sm:$0xff]  }
 0x174   :  { %4262 = vmatprep.subr.bf16.mxu0 %v5858_v56  ;;  %v5918_v62 = vld [vmem:[%s8409_s1 + $0x64] ss:$148 sps:$4 sm:$0xff]  }
 0x176   :  { %4304 = vmatpush2.bf16.msra.mxu1 %v5892_v6  ;;  %v5916_v6 = vld [vmem:[%s8409_s1 + $0x60] ss:$148 sps:$4 sm:$0xff]  }
 0x177   :  { %4263 = vmatpush2.bf16.msra.mxu0 %v5856_v59  ;;  %4305 = vmatprep.subr.bf16.mxu1 %v5900_v61  ;;  %v5915_v59 = vld [vmem:[%s8409_s1 + $0x18c] ss:$148 sps:$4 sm:$0xff]   ;;  %v5924_v61 = vld [vmem:[%s8409_s1 + $0x11bc] ss:$148 sps:$4 sm:$0xff]  }
 0x178   :  { %4264 = vmatprep.subr.bf16.mxu0 %v5864_v0  ;;  %v5937_v0 = vld [vmem:[%s8409_s1 + $0x508] ss:$148 sps:$4 sm:$0xff]  }
 0x17a   :  { %4306 = vmatpush2.bf16.msra.mxu1 %v5898_v3  ;;  %v5922_v3 = vld [vmem:[%s8409_s1 + $0x11b8] ss:$148 sps:$4 sm:$0xff]  }
 0x17b   :  { %4265 = vmatpush2.bf16.msra.mxu0 %v5862_v2  ;;  %4307 = vmatprep.subr.bf16.mxu1 %v5906_v15  ;;  %v5945_v2 = vld [vmem:[%s8409_s1 + $0x3e4] ss:$148 sps:$4 sm:$0xff]  }
 0x17c   :  { %4266 = vmatprep.subr.bf16.mxu0 %v5870_v5  ;;  %v5943_v5 = vld [vmem:[%s8409_s1 + $0x3e0] ss:$148 sps:$4 sm:$0xff]   ;;  %v5955_v15 = vld [vmem:[%s8409_s1 + $0x190] ss:$148 sps:$4 sm:$0xff]  }
 0x17e   :  { %4308 = vmatpush2.bf16.msra.mxu1 %v5904_v34  ;;  %v5961_v34 = vld [vmem:[%s8409_s1 + $0x68] ss:$148 sps:$4 sm:$0xff]  }
 0x17f   :  { %4267 = vmatpush2.bf16.msra.mxu0 %v5868_v7  ;;  %4309 = vmatprep.subr.bf16.mxu1 %v5912_v22  ;;  %v5951_v7 = vld [vmem:[%s8409_s1 + $0x2bc] ss:$148 sps:$4 sm:$0xff]   ;;  %v5942_v22 = vld [vmem:[%s8409_s1 + $0xe44] ss:$148 sps:$4 sm:$0xff]  }
 0x180   :  { %4322 = vmatprep.subr.bf16.mxu0 %v5879_v12  ;;  %v5949_v12 = vld [vmem:[%s8409_s1 + $0x2b8] ss:$148 sps:$4 sm:$0xff]  }
 0x182   :  { %v4012_v19 = vpop.f32.mrf.mxu0  ;;  %4269 = vmatmul.mubr.bf16.vlgmr.msra.gmra.mxu0 %v7355_v11  ;;  %4310 = vmatpush2.bf16.msra.mxu1 %v5910_v28  ;;  %v5970_v28 = vld [vmem:[%s8409_s1 + $0x1098] ss:$148 sps:$4 sm:$0xff]  }
 0x183   :  { %v4013_v20 = vadd.f32 %v4012_v19, %v670_v13  ;;  %4323 = vmatpush1.bf16.msra.mxu0 %v5877_v14  ;;  %4354 = vmatprep.mubr.bf16.mxu0 %v7300_v52  ;;  %v5930_v14 = vld [vmem:[%s8409_s1 + $0x1094] ss:$148 sps:$4 sm:$0xff]   ;;  %v5936_v19 = vld [vmem:[%s8409_s1 + $0xf6c] ss:$148 sps:$4 sm:$0xff]  }
 0x184   :  { %v4014_v23 = vpop.f32.mrf.mxu0  ;;  %4324 = vmatprep.subr.bf16.mxu0 %v5885_v16  ;;  %4365 = vmatprep.subr.bf16.mxu1 %v5921_v32  ;;  %v5928_v16 = vld [vmem:[%s8409_s1 + $0x1090] ss:$148 sps:$4 sm:$0xff]   ;;  %v5954_v32 = vld [vmem:[%s8409_s1 + $0xbf4] ss:$148 sps:$4 sm:$0xff]  }
 0x185   :  { %4629 = vst [vmem:[%s8412_s3 + $0x40] sm:$0xff] %v4013_v20  ;;  %v4015_v25 = vadd.f32 %v4014_v23, %v674_v18  ;;  %v4055_v45 = vpop.f32.mrf.mxu1  ;;  %4312 = vmatmul.mubr.bf16.vlgmr.msra.gmra.mxu1 %v7355_v11  ;;  %v5934_v20 = vld [vmem:[%s8409_s1 + $0xf68] ss:$148 sps:$4 sm:$0xff]   ;;  %v5967_v23 = vld [vmem:[%s8409_s1 + $0x11c0] ss:$148 sps:$4 sm:$0xff]  }
 0x186   :  { %v4016_v27 = vpop.f32.mrf.mxu0  ;;  %v4056_v8 = vadd.f32 %v4055_v45, %v678_v39  ;;  %4366 = vmatpush1.bf16.msra.mxu1 %v5919_v38  ;;  %4397 = vmatprep.mubr.bf16.mxu1 %v7300_v52  ;;  %v5960_v38 = vld [vmem:[%s8409_s1 + $0xacc] ss:$148 sps:$4 sm:$0xff]  }
 0x187   :  { %4630 = vst [vmem:[%s8412_s3 + $0x48] sm:$0xff] %v4015_v25  ;;  %v4017_v29 = vadd.f32 %v4016_v27, %v670_v13  ;;  %4325 = vmatpush1.bf16.msra.mxu0 %v5883_v21  ;;  %v4057_v48 = vpop.f32.mrf.mxu1  ;;  %4367 = vmatprep.subr.bf16.mxu1 %v5927_v42  ;;  %v5957_v13 = vld [vmem:[%s8409_s1 + $0x194] ss:$148 sps:$4 sm:$0xff]   ;;  %v5969_v21 = vld [vmem:[%s8409_s1 + $0x11c4] ss:$148 sps:$4 sm:$0xff]  }
 0x188   :  { %v4018_v33 = vpop.f32.mrf.mxu0  ;;  %4326 = vmatprep.subr.bf16.mxu0 %v5891_v24  ;;  %4631 = vst [vmem:[%s8412_s3 + $0x50] sm:$0xff] %v4056_v8  ;;  %v4058_v51 = vadd.f32 %v4057_v48, %v682_v44  ;;  %v5940_v24 = vld [vmem:[%s8409_s1 + $0xe40] ss:$148 sps:$4 sm:$0xff]   ;;  %v5972_v25 = vld [vmem:[%s8409_s1 + $0x109c] ss:$148 sps:$4 sm:$0xff]   ;;  %v686_v48 = vrot.slane %v7512_v10, %v7257_v36 }
 0x189   :  { %4667 = vst [vmem:[%s8412_s3 + $0x168] sm:$0xff] %v4017_v29  ;;  %v4019_v37 = vadd.f32 %v4018_v33, %v674_v18  ;;  %v4059_v17 = vpop.f32.mrf.mxu1  ;;  %v5963_v18 = vld [vmem:[%s8409_s1 + $0x6c] ss:$148 sps:$4 sm:$0xff]   ;;  %v5948_v27 = vld [vmem:[%s8409_s1 + $0xd1c] ss:$148 sps:$4 sm:$0xff]  }
 0x18a   :  { %4632 = vst [vmem:[%s8412_s3 + $0x58] sm:$0xff] %v4058_v51  ;;  %v4060_v53 = vadd.f32 %v4059_v17, %v678_v39  ;;  %4368 = vmatpush1.bf16.msra.mxu1 %v5925_v46  ;;  %v5946_v29 = vld [vmem:[%s8409_s1 + $0xd18] ss:$148 sps:$4 sm:$0xff]   ;;  %v5976_v33 = vld [vmem:[%s8409_s1 + $0xf70] ss:$148 sps:$4 sm:$0xff]   ;;  %v690_v17 = vrot.slane %v7512_v10, %v7272_v41 }
 0x18b   :  { %4668 = vst [vmem:[%s8412_s3 + $0x170] sm:$0xff] %v4019_v37  ;;  %4327 = vmatpush1.bf16.msra.mxu0 %v5889_v31  ;;  %v4061_v56 = vpop.f32.mrf.mxu1  ;;  %4369 = vmatprep.subr.bf16.mxu1 %v5933_v49  ;;  %v5978_v31 = vld [vmem:[%s8409_s1 + $0xf74] ss:$148 sps:$4 sm:$0xff]   ;;  %v5984_v37 = vld [vmem:[%s8409_s1 + $0xe4c] ss:$148 sps:$4 sm:$0xff]  }
 0x18c   :  { %4328 = vmatprep.subr.bf16.mxu0 %v5897_v35  ;;  %4669 = vst [vmem:[%s8412_s3 + $0x178] sm:$0xff] %v4060_v53  ;;  %v4062_v60 = vadd.f32 %v4061_v56, %v682_v44  ;;  %v5952_v35 = vld [vmem:[%s8409_s1 + $0xbf0] ss:$148 sps:$4 sm:$0xff]   ;;  %v5982_v39 = vld [vmem:[%s8409_s1 + $0xe48] ss:$148 sps:$4 sm:$0xff]  }
 0x18d   :  { %v5990_v42 = vld [vmem:[%s8409_s1 + $0xd24] ss:$148 sps:$4 sm:$0xff]   ;;  %v5988_v44 = vld [vmem:[%s8409_s1 + $0xd20] ss:$148 sps:$4 sm:$0xff]   ;;  %v5996_v8 = vld [vmem:[%s8409_s1 + $0xbfc] ss:$148 sps:$4 sm:$0xff]  }
 0x18e   :  { %4670 = vst [vmem:[%s8412_s3 + $0x180] sm:$0xff] %v4062_v60  ;;  %4370 = vmatpush1.bf16.msra.mxu1 %v5931_v54  ;;  %v5964_v45 = vld [vmem:[%s8409_s1 + $0x9a0] ss:$148 sps:$4 sm:$0xff]   ;;  %v5973_v49 = vld [vmem:[%s8409_s1 + $0x888] ss:$148 sps:$4 sm:$0xff]  }
 0x18f   :  { %4329 = vmatpush1.bf16.msra.mxu0 %v5895_v40  ;;  %4371 = vmatprep.subr.bf16.mxu1 %v5939_v58  ;;  %v5958_v40 = vld [vmem:[%s8409_s1 + $0xac8] ss:$148 sps:$4 sm:$0xff]   ;;  %v5975_v46 = vld [vmem:[%s8409_s1 + $0x88c] ss:$148 sps:$4 sm:$0xff]   ;;  %v5981_v51 = vld [vmem:[%s8409_s1 + $0x764] ss:$148 sps:$4 sm:$0xff]  }
 0x190   :  { %4330 = vmatprep.subr.bf16.mxu0 %v5903_v43  ;;  %v5966_v43 = vld [vmem:[%s8409_s1 + $0x9a4] ss:$148 sps:$4 sm:$0xff]   ;;  %v5979_v56 = vld [vmem:[%s8409_s1 + $0x760] ss:$148 sps:$4 sm:$0xff]   ;;  %v5987_v60 = vld [vmem:[%s8409_s1 + $0x63c] ss:$148 sps:$4 sm:$0xff]  }
 0x191   :  { %v6000_v54 = vld [vmem:[%s8409_s1 + $0xad0] ss:$148 sps:$4 sm:$0xff]   ;;  %v6008_v58 = vld [vmem:[%s8409_s1 + $0x9ac] ss:$148 sps:$4 sm:$0xff]  }
 0x192   :  { %4372 = vmatpush1.bf16.msra.mxu1 %v5937_v0 }
 0x193   :  { %4331 = vmatpush1.bf16.msra.mxu0 %v5901_v47  ;;  %4373 = vmatprep.subr.bf16.mxu1 %v5945_v2  ;;  %v5994_v47 = vld [vmem:[%s8409_s1 + $0xbf8] ss:$148 sps:$4 sm:$0xff]   ;;  %v6006_v2 = vld [vmem:[%s8409_s1 + $0x9a8] ss:$148 sps:$4 sm:$0xff]  }
 0x194   :  { %4332 = vmatprep.subr.bf16.mxu0 %v5909_v50  ;;  %v6002_v50 = vld [vmem:[%s8409_s1 + $0xad4] ss:$148 sps:$4 sm:$0xff]  }
 0x196   :  { %4374 = vmatpush1.bf16.msra.mxu1 %v5943_v5  ;;  %v5985_v5 = vld [vmem:[%s8409_s1 + $0x638] ss:$148 sps:$4 sm:$0xff]  }
 0x197   :  { %4333 = vmatpush1.bf16.msra.mxu0 %v5907_v55  ;;  %4375 = vmatprep.subr.bf16.mxu1 %v5951_v7 }
 0x198   :  { %4334 = vmatprep.subr.bf16.mxu0 %v5915_v59 }
 0x19a   :  { %4376 = vmatpush1.bf16.msra.mxu1 %v5949_v12 }
 0x19b   :  { %4335 = vmatpush1.bf16.msra.mxu0 %v5913_v1  ;;  %4377 = vmatprep.subr.bf16.mxu1 %v5957_v13  ;;  %v694_v13 = vrot.slane %v7512_v10, %v7316_v57 }
 0x19c   :  { %4336 = vmatprep.subr.bf16.mxu0 %v5918_v62 }
 0x19e   :  { %4378 = vmatpush1.bf16.msra.mxu1 %v5955_v15  ;;  %v6023_v15 = vld [vmem:[%s8409_s1 + $0x76c] ss:$148 sps:$4 sm:$0xff]  }
 0x19f   :  { %4337 = vmatpush1.bf16.msra.mxu0 %v5916_v6  ;;  %4379 = vmatprep.subr.bf16.mxu1 %v5963_v18  ;;  %v6017_v6 = vld [vmem:[%s8409_s1 + $0x894] ss:$148 sps:$4 sm:$0xff]   ;;  %v698_v18 = vrot.slane %v7512_v10, %v7325_v63  ;;  %v6029_v10 = vld [vmem:[%s8409_s1 + $0x644] ss:$148 sps:$4 sm:$0xff]  }
 0x1a0   :  { %4338 = vmatprep.subr.bf16.mxu0 %v5924_v61  ;;  %v5993_v61 = vld [vmem:[%s8409_s1 + $0x514] ss:$148 sps:$4 sm:$0xff]  }
 0x1a2   :  { %4380 = vmatpush1.bf16.msra.mxu1 %v5961_v34 }
 0x1a3   :  { %4339 = vmatpush2.bf16.msra.mxu0 %v5922_v3  ;;  %4381 = vmatprep.subr.bf16.mxu1 %v5969_v21  ;;  %v6015_v3 = vld [vmem:[%s8409_s1 + $0x890] ss:$148 sps:$4 sm:$0xff]   ;;  %v5997_v21 = vld [vmem:[%s8409_s1 + $0x3e8] ss:$148 sps:$4 sm:$0xff]  }
 0x1a4   :  { %4340 = vmatprep.subr.bf16.mxu0 %v5930_v14  ;;  %v5991_v14 = vld [vmem:[%s8409_s1 + $0x510] ss:$148 sps:$4 sm:$0xff]  }
 0x1a6   :  { %4382 = vmatpush2.bf16.msra.mxu1 %v5967_v23  ;;  %v6005_v23 = vld [vmem:[%s8409_s1 + $0x2c4] ss:$148 sps:$4 sm:$0xff]  }
 0x1a7   :  { %4341 = vmatpush2.bf16.msra.mxu0 %v5928_v16  ;;  %4383 = vmatprep.subr.bf16.mxu1 %v5972_v25  ;;  %v5999_v16 = vld [vmem:[%s8409_s1 + $0x3ec] ss:$148 sps:$4 sm:$0xff]  }
 0x1a8   :  { %4342 = vmatprep.subr.bf16.mxu0 %v5936_v19 }
 0x1aa   :  { %4384 = vmatpush2.bf16.msra.mxu1 %v5970_v28  ;;  %v6003_v28 = vld [vmem:[%s8409_s1 + $0x2c0] ss:$148 sps:$4 sm:$0xff]  }
 0x1ab   :  { %4343 = vmatpush2.bf16.msra.mxu0 %v5934_v20  ;;  %4385 = vmatprep.subr.bf16.mxu1 %v5978_v31  ;;  %v6021_v20 = vld [vmem:[%s8409_s1 + $0x768] ss:$148 sps:$4 sm:$0xff]  }
 0x1ac   :  { %4344 = vmatprep.subr.bf16.mxu0 %v5942_v22  ;;  %v6035_v31 = vld [vmem:[%s8409_s1 + $0x51c] ss:$148 sps:$4 sm:$0xff]  }
 0x1ae   :  { %4386 = vmatpush2.bf16.msra.mxu1 %v5976_v33 }
 0x1af   :  { %4345 = vmatpush2.bf16.msra.mxu0 %v5940_v24  ;;  %4387 = vmatprep.subr.bf16.mxu1 %v5984_v37  ;;  %v6009_v37 = vld [vmem:[%s8409_s1 + $0x198] ss:$148 sps:$4 sm:$0xff]  }
 0x1b0   :  { %4346 = vmatprep.subr.bf16.mxu0 %v5948_v27  ;;  %v6027_v27 = vld [vmem:[%s8409_s1 + $0x640] ss:$148 sps:$4 sm:$0xff]  }
 0x1b2   :  { %4388 = vmatpush2.bf16.msra.mxu1 %v5982_v39  ;;  %v6014_v39 = vld [vmem:[%s8409_s1 + $0x74] ss:$148 sps:$4 sm:$0xff]  }
 0x1b3   :  { %4347 = vmatpush2.bf16.msra.mxu0 %v5946_v29  ;;  %4389 = vmatprep.subr.bf16.mxu1 %v5990_v42  ;;  %v6012_v42 = vld [vmem:[%s8409_s1 + $0x70] ss:$148 sps:$4 sm:$0xff]  }
 0x1b4   :  { %4348 = vmatprep.subr.bf16.mxu0 %v5954_v32  ;;  %v6011_v32 = vld [vmem:[%s8409_s1 + $0x19c] ss:$148 sps:$4 sm:$0xff]  }
 0x1b6   :  { %4390 = vmatpush2.bf16.msra.mxu1 %v5988_v44  ;;  %v6020_v44 = vld [vmem:[%s8409_s1 + $0x11cc] ss:$148 sps:$4 sm:$0xff]  }
 0x1b7   :  { %4349 = vmatpush2.bf16.msra.mxu0 %v5952_v35  ;;  %4391 = vmatprep.subr.bf16.mxu1 %v5996_v8  ;;  %v6033_v35 = vld [vmem:[%s8409_s1 + $0x518] ss:$148 sps:$4 sm:$0xff]   ;;  %v6018_v8 = vld [vmem:[%s8409_s1 + $0x11c8] ss:$148 sps:$4 sm:$0xff]  }
 0x1b8   :  { %4350 = vmatprep.subr.bf16.mxu0 %v5960_v38  ;;  %v6041_v38 = vld [vmem:[%s8409_s1 + $0x3f4] ss:$148 sps:$4 sm:$0xff]  }
 0x1ba   :  { %4392 = vmatpush2.bf16.msra.mxu1 %v5994_v47  ;;  %v6026_v47 = vld [vmem:[%s8409_s1 + $0x10a4] ss:$148 sps:$4 sm:$0xff]  }
 0x1bb   :  { %4351 = vmatpush2.bf16.msra.mxu0 %v5958_v40  ;;  %4393 = vmatprep.subr.bf16.mxu1 %v6002_v50  ;;  %v6039_v40 = vld [vmem:[%s8409_s1 + $0x3f0] ss:$148 sps:$4 sm:$0xff]  }
 0x1bc   :  { %4352 = vmatprep.subr.bf16.mxu0 %v5966_v43  ;;  %v6047_v43 = vld [vmem:[%s8409_s1 + $0x2cc] ss:$148 sps:$4 sm:$0xff]   ;;  %v6059_v50 = vld [vmem:[%s8409_s1 + $0x7c] ss:$148 sps:$4 sm:$0xff]  }
 0x1be   :  { %4394 = vmatpush2.bf16.msra.mxu1 %v6000_v54  ;;  %v6065_v54 = vld [vmem:[%s8409_s1 + $0x11d4] ss:$148 sps:$4 sm:$0xff]  }
 0x1bf   :  { %4353 = vmatpush2.bf16.msra.mxu0 %v5964_v45  ;;  %4395 = vmatprep.subr.bf16.mxu1 %v6008_v58  ;;  %v6045_v45 = vld [vmem:[%s8409_s1 + $0x2c8] ss:$148 sps:$4 sm:$0xff]   ;;  %v6036_v58 = vld [vmem:[%s8409_s1 + $0xe50] ss:$148 sps:$4 sm:$0xff]  }
 0x1c0   :  { %4408 = vmatprep.subr.bf16.mxu0 %v5975_v46  ;;  %v6053_v46 = vld [vmem:[%s8409_s1 + $0x1a4] ss:$148 sps:$4 sm:$0xff]  }
 0x1c2   :  { %v4098_v53 = vpop.f32.mrf.mxu0  ;;  %4355 = vmatmul.mubr.bf16.vlgmr.msra.gmra.mxu0 %v7355_v11  ;;  %4396 = vmatpush2.bf16.msra.mxu1 %v6006_v2  ;;  %v6074_v2 = vld [vmem:[%s8409_s1 + $0xf84] ss:$148 sps:$4 sm:$0xff]  }
 0x1c3   :  { %v4099_v55 = vadd.f32 %v4098_v53, %v686_v48  ;;  %4409 = vmatpush1.bf16.msra.mxu0 %v5973_v49  ;;  %4440 = vmatprep.mubr.bf16.mxu0 %v7300_v52  ;;  %v6024_v49 = vld [vmem:[%s8409_s1 + $0x10a0] ss:$148 sps:$4 sm:$0xff]   ;;  %v6030_v53 = vld [vmem:[%s8409_s1 + $0xf78] ss:$148 sps:$4 sm:$0xff]  }
 0x1c4   :  { %v4100_v59 = vpop.f32.mrf.mxu0  ;;  %4410 = vmatprep.subr.bf16.mxu0 %v5981_v51  ;;  %4451 = vmatprep.subr.bf16.mxu1 %v6017_v6  ;;  %v6032_v51 = vld [vmem:[%s8409_s1 + $0xf7c] ss:$148 sps:$4 sm:$0xff]   ;;  %v6048_v6 = vld [vmem:[%s8409_s1 + $0xc00] ss:$148 sps:$4 sm:$0xff]  }
 0x1c5   :  { %4633 = vst [vmem:[%s8412_s3 + $0x60] sm:$0xff] %v4099_v55  ;;  %v4101_v0 = vadd.f32 %v4100_v59, %v690_v17  ;;  %v4141_v19 = vpop.f32.mrf.mxu1  ;;  %4398 = vmatmul.mubr.bf16.vlgmr.msra.gmra.mxu1 %v7355_v11  ;;  %v6038_v55 = vld [vmem:[%s8409_s1 + $0xe54] ss:$148 sps:$4 sm:$0xff]   ;;  %v6068_v59 = vld [vmem:[%s8409_s1 + $0x10ac] ss:$148 sps:$4 sm:$0xff]  }
 0x1c6   :  { %v4102_v1 = vpop.f32.mrf.mxu0  ;;  %v4142_v34 = vadd.f32 %v4141_v19, %v694_v13  ;;  %4452 = vmatpush1.bf16.msra.mxu1 %v6015_v3  ;;  %4483 = vmatprep.mubr.bf16.mxu1 %v7300_v52  ;;  %v6054_v3 = vld [vmem:[%s8409_s1 + $0xad8] ss:$148 sps:$4 sm:$0xff]   ;;  %v7973_v19 = vld [vmem:[%s8411_s2 + $0x10] sm:$0xff] }
 0x1c7   :  { %4634 = vst [vmem:[%s8412_s3 + $0x68] sm:$0xff] %v4101_v0  ;;  %v4103_v62 = vadd.f32 %v4102_v1, %v686_v48  ;;  %4411 = vmatpush1.bf16.msra.mxu0 %v5979_v56  ;;  %v4143_v22 = vpop.f32.mrf.mxu1  ;;  %4453 = vmatprep.subr.bf16.mxu1 %v6023_v15  ;;  %v6051_v48 = vld [vmem:[%s8409_s1 + $0x1a0] ss:$148 sps:$4 sm:$0xff]   ;;  %v6063_v56 = vld [vmem:[%s8409_s1 + $0x11d0] ss:$148 sps:$4 sm:$0xff]  }
 0x1c8   :  { %v4104_v7 = vpop.f32.mrf.mxu0  ;;  %4412 = vmatprep.subr.bf16.mxu0 %v5987_v60  ;;  %4635 = vst [vmem:[%s8412_s3 + $0x70] sm:$0xff] %v4142_v34  ;;  %v4144_v52 = vadd.f32 %v4143_v22, %v698_v18  ;;  %v6044_v60 = vld [vmem:[%s8409_s1 + $0xd2c] ss:$148 sps:$4 sm:$0xff]   ;;  %v6066_v0 = vld [vmem:[%s8409_s1 + $0x10a8] ss:$148 sps:$4 sm:$0xff]  }
 0x1c9   :  { %4671 = vst [vmem:[%s8412_s3 + $0x188] sm:$0xff] %v4103_v62  ;;  %v4105_v12 = vadd.f32 %v4104_v7, %v690_v17  ;;  %v4145_v24 = vpop.f32.mrf.mxu1  ;;  %v6057_v17 = vld [vmem:[%s8409_s1 + $0x78] ss:$148 sps:$4 sm:$0xff]   ;;  %v6042_v1 = vld [vmem:[%s8409_s1 + $0xd28] ss:$148 sps:$4 sm:$0xff]  }
 0x1ca   :  { %4636 = vst [vmem:[%s8412_s3 + $0x78] sm:$0xff] %v4144_v52  ;;  %v4146_v25 = vadd.f32 %v4145_v24, %v694_v13  ;;  %4454 = vmatpush1.bf16.msra.mxu1 %v6021_v20  ;;  %v6050_v62 = vld [vmem:[%s8409_s1 + $0xc04] ss:$148 sps:$4 sm:$0xff]   ;;  %v6080_v7 = vld [vmem:[%s8409_s1 + $0xe5c] ss:$148 sps:$4 sm:$0xff]   ;;  %v706_v52 = vrot.slane %v7973_v19, %v7032_v9 }
 0x1cb   :  { %4672 = vst [vmem:[%s8412_s3 + $0x190] sm:$0xff] %v4105_v12  ;;  %4413 = vmatpush1.bf16.msra.mxu0 %v5985_v5  ;;  %v4147_v29 = vpop.f32.mrf.mxu1  ;;  %4455 = vmatprep.subr.bf16.mxu1 %v6029_v10  ;;  %v6072_v5 = vld [vmem:[%s8409_s1 + $0xf80] ss:$148 sps:$4 sm:$0xff]   ;;  %v6078_v12 = vld [vmem:[%s8409_s1 + $0xe58] ss:$148 sps:$4 sm:$0xff]  }
 0x1cc   :  { %4414 = vmatprep.subr.bf16.mxu0 %v5993_v61  ;;  %4673 = vst [vmem:[%s8412_s3 + $0x198] sm:$0xff] %v4146_v25  ;;  %v4148_v33 = vadd.f32 %v4147_v29, %v698_v18  ;;  %v6056_v61 = vld [vmem:[%s8409_s1 + $0xadc] ss:$148 sps:$4 sm:$0xff]   ;;  %v6086_v13 = vld [vmem:[%s8409_s1 + $0xd34] ss:$148 sps:$4 sm:$0xff]  }
 0x1cd   :  { %v6084_v15 = vld [vmem:[%s8409_s1 + $0xd30] ss:$148 sps:$4 sm:$0xff]   ;;  %v6092_v18 = vld [vmem:[%s8409_s1 + $0xc0c] ss:$148 sps:$4 sm:$0xff]   ;;  %v6090_v20 = vld [vmem:[%s8409_s1 + $0xc08] ss:$148 sps:$4 sm:$0xff]  }
 0x1ce   :  { %4674 = vst [vmem:[%s8412_s3 + $0x1a0] sm:$0xff] %v4148_v33  ;;  %4456 = vmatpush1.bf16.msra.mxu1 %v6027_v27  ;;  %v6071_v34 = vld [vmem:[%s8409_s1 + $0x89c] ss:$148 sps:$4 sm:$0xff]   ;;  %v6069_v22 = vld [vmem:[%s8409_s1 + $0x898] ss:$148 sps:$4 sm:$0xff]  }
 0x1cf   :  { %4415 = vmatpush1.bf16.msra.mxu0 %v5991_v14  ;;  %4457 = vmatprep.subr.bf16.mxu1 %v6035_v31  ;;  %v6062_v14 = vld [vmem:[%s8409_s1 + $0x9b4] ss:$148 sps:$4 sm:$0xff]   ;;  %v6098_v10 = vld [vmem:[%s8409_s1 + $0xae4] ss:$148 sps:$4 sm:$0xff]   ;;  %v6104_v29 = vld [vmem:[%s8409_s1 + $0x9bc] ss:$148 sps:$4 sm:$0xff]  }
 0x1d0   :  { %4416 = vmatprep.subr.bf16.mxu0 %v5999_v16  ;;  %v6060_v16 = vld [vmem:[%s8409_s1 + $0x9b0] ss:$148 sps:$4 sm:$0xff]   ;;  %v6096_v25 = vld [vmem:[%s8409_s1 + $0xae0] ss:$148 sps:$4 sm:$0xff]  }
 0x1d2   :  { %4458 = vmatpush1.bf16.msra.mxu1 %v6033_v35 }
 0x1d3   :  { %4417 = vmatpush1.bf16.msra.mxu0 %v5997_v21  ;;  %4459 = vmatprep.subr.bf16.mxu1 %v6041_v38  ;;  %v702_v21 = vrot.slane %v7973_v19, %v7017_v4 }
 0x1d4   :  { %4418 = vmatprep.subr.bf16.mxu0 %v6005_v23  ;;  %v6077_v23 = vld [vmem:[%s8409_s1 + $0x774] ss:$148 sps:$4 sm:$0xff]  }
 0x1d6   :  { %4460 = vmatpush1.bf16.msra.mxu1 %v6039_v40  ;;  %v6113_v40 = vld [vmem:[%s8409_s1 + $0x8a4] ss:$148 sps:$4 sm:$0xff]  }
 0x1d7   :  { %4419 = vmatpush1.bf16.msra.mxu0 %v6003_v28  ;;  %4461 = vmatprep.subr.bf16.mxu1 %v6047_v43  ;;  %v6075_v28 = vld [vmem:[%s8409_s1 + $0x770] ss:$148 sps:$4 sm:$0xff]  }
 0x1d8   :  { %4420 = vmatprep.subr.bf16.mxu0 %v6011_v32  ;;  %v8010_v32 = vld [vmem:[%s8410_s0 + $0x4] ss:$8 sps:$4 sm:$0xff]  }
 0x1d9   :  { %v6089_v43 = vld [vmem:[%s8409_s1 + $0x524] ss:$148 sps:$4 sm:$0xff]  }
 0x1da   :  { %4462 = vmatpush1.bf16.msra.mxu1 %v6045_v45  ;;  %v6111_v45 = vld [vmem:[%s8409_s1 + $0x8a0] ss:$148 sps:$4 sm:$0xff]  }
 0x1db   :  { %4421 = vmatpush1.bf16.msra.mxu0 %v6009_v37  ;;  %4463 = vmatprep.subr.bf16.mxu1 %v6053_v46  ;;  %v6102_v37 = vld [vmem:[%s8409_s1 + $0x9b8] ss:$148 sps:$4 sm:$0xff]   ;;  %v6087_v46 = vld [vmem:[%s8409_s1 + $0x520] ss:$148 sps:$4 sm:$0xff]  }
 0x1dc   :  { %4422 = vmatprep.subr.bf16.mxu0 %v6014_v39  ;;  %v6081_v39 = vld [vmem:[%s8409_s1 + $0x648] ss:$148 sps:$4 sm:$0xff]  }
 0x1de   :  { %4464 = vmatpush1.bf16.msra.mxu1 %v6051_v48  ;;  %v6095_v48 = vld [vmem:[%s8409_s1 + $0x3fc] ss:$148 sps:$4 sm:$0xff]  }
 0x1df   :  { %4423 = vmatpush1.bf16.msra.mxu0 %v6012_v42  ;;  %4465 = vmatprep.subr.bf16.mxu1 %v6059_v50 }
 0x1e0   :  { %4424 = vmatprep.subr.bf16.mxu0 %v6020_v44 }
 0x1e2   :  { %4466 = vmatpush1.bf16.msra.mxu1 %v6057_v17 }
 0x1e3   :  { %4425 = vmatpush2.bf16.msra.mxu0 %v6018_v8  ;;  %4467 = vmatprep.subr.bf16.mxu1 %v6065_v54  ;;  %v710_v8 = vrot.slane %v7973_v19, %v7071_v26  ;;  %v6093_v54 = vld [vmem:[%s8409_s1 + $0x3f8] ss:$148 sps:$4 sm:$0xff]  }
 0x1e4   :  { %4426 = vmatprep.subr.bf16.mxu0 %v6026_v47  ;;  %v6119_v47 = vld [vmem:[%s8409_s1 + $0x77c] ss:$148 sps:$4 sm:$0xff]  }
 0x1e6   :  { %4468 = vmatpush2.bf16.msra.mxu1 %v6063_v56  ;;  %v6125_v56 = vld [vmem:[%s8409_s1 + $0x654] ss:$148 sps:$4 sm:$0xff]  }
 0x1e7   :  { %4427 = vmatpush2.bf16.msra.mxu0 %v6024_v49  ;;  %4469 = vmatprep.subr.bf16.mxu1 %v6068_v59  ;;  %v714_v49 = vrot.slane %v7973_v19, %v7080_v30 }
 0x1e8   :  { %4428 = vmatprep.subr.bf16.mxu0 %v6032_v51  ;;  %v8056_v51 = vld [vmem:[%s8410_s0] ss:$8 sps:$4 sm:$0xff]  }
 0x1ea   :  { %4470 = vmatpush2.bf16.msra.mxu1 %v6066_v0 }
 0x1eb   :  { %4429 = vmatpush2.bf16.msra.mxu0 %v6030_v53  ;;  %4471 = vmatprep.subr.bf16.mxu1 %v6074_v2  ;;  %v6117_v53 = vld [vmem:[%s8409_s1 + $0x778] ss:$148 sps:$4 sm:$0xff]   ;;  %v6099_v2 = vld [vmem:[%s8409_s1 + $0x2d0] ss:$148 sps:$4 sm:$0xff]  }
 0x1ec   :  { %4430 = vmatprep.subr.bf16.mxu0 %v6038_v55 }
 0x1ee   :  { %4472 = vmatpush2.bf16.msra.mxu1 %v6072_v5  ;;  %v6131_v5 = vld [vmem:[%s8409_s1 + $0x52c] ss:$148 sps:$4 sm:$0xff]  }
 0x1ef   :  { %4431 = vmatpush2.bf16.msra.mxu0 %v6036_v58  ;;  %4473 = vmatprep.subr.bf16.mxu1 %v6080_v7  ;;  %v6101_v58 = vld [vmem:[%s8409_s1 + $0x2d4] ss:$148 sps:$4 sm:$0xff]  }
 0x1f0   :  { %4432 = vmatprep.subr.bf16.mxu0 %v6044_v60 }
 0x1f2   :  { %4474 = vmatpush2.bf16.msra.mxu1 %v6078_v12  ;;  %v6105_v12 = vld [vmem:[%s8409_s1 + $0x1a8] ss:$148 sps:$4 sm:$0xff]  }
 0x1f3   :  { %4433 = vmatpush2.bf16.msra.mxu0 %v6042_v1  ;;  %4475 = vmatprep.subr.bf16.mxu1 %v6086_v13  ;;  %v6123_v1 = vld [vmem:[%s8409_s1 + $0x650] ss:$148 sps:$4 sm:$0xff]  }
 0x1f4   :  { %4434 = vmatprep.subr.bf16.mxu0 %v6050_v62  ;;  %v6110_v13 = vld [vmem:[%s8409_s1 + $0x84] ss:$148 sps:$4 sm:$0xff]  }
 0x1f6   :  { %4476 = vmatpush2.bf16.msra.mxu1 %v6084_v15  ;;  %v6108_v15 = vld [vmem:[%s8409_s1 + $0x80] ss:$148 sps:$4 sm:$0xff]  }
 0x1f7   :  { %4435 = vmatpush2.bf16.msra.mxu0 %v6048_v6  ;;  %4477 = vmatprep.subr.bf16.mxu1 %v6092_v18  ;;  %v6107_v6 = vld [vmem:[%s8409_s1 + $0x1ac] ss:$148 sps:$4 sm:$0xff]   ;;  %v6116_v18 = vld [vmem:[%s8409_s1 + $0x11dc] ss:$148 sps:$4 sm:$0xff]  }
 0x1f8   :  { %4436 = vmatprep.subr.bf16.mxu0 %v6056_v61  ;;  %v6129_v61 = vld [vmem:[%s8409_s1 + $0x528] ss:$148 sps:$4 sm:$0xff]  }
 0x1fa   :  { %4478 = vmatpush2.bf16.msra.mxu1 %v6090_v20  ;;  %v6114_v20 = vld [vmem:[%s8409_s1 + $0x11d8] ss:$148 sps:$4 sm:$0xff]  }
 0x1fb   :  { %4437 = vmatpush2.bf16.msra.mxu0 %v6054_v3  ;;  %4479 = vmatprep.subr.bf16.mxu1 %v6098_v10  ;;  %v6137_v3 = vld [vmem:[%s8409_s1 + $0x404] ss:$148 sps:$4 sm:$0xff]  }
 0x1fc   :  { %4438 = vmatprep.subr.bf16.mxu0 %v6062_v14  ;;  %v6135_v14 = vld [vmem:[%s8409_s1 + $0x400] ss:$148 sps:$4 sm:$0xff]   ;;  %v6147_v10 = vld [vmem:[%s8409_s1 + $0x1b0] ss:$148 sps:$4 sm:$0xff]  }
 0x1fe   :  { %4480 = vmatpush2.bf16.msra.mxu1 %v6096_v25  ;;  %v6153_v25 = vld [vmem:[%s8409_s1 + $0x88] ss:$148 sps:$4 sm:$0xff]  }
 0x1ff   :  { %4439 = vmatpush2.bf16.msra.mxu0 %v6060_v16  ;;  %4481 = vmatprep.subr.bf16.mxu1 %v6104_v29  ;;  %v6143_v16 = vld [vmem:[%s8409_s1 + $0x2dc] ss:$148 sps:$4 sm:$0xff]   ;;  %v6134_v29 = vld [vmem:[%s8409_s1 + $0xe64] ss:$148 sps:$4 sm:$0xff]  }
 0x200   :  { %4494 = vmatprep.subr.bf16.mxu0 %v6071_v34  ;;  %v6141_v34 = vld [vmem:[%s8409_s1 + $0x2d8] ss:$148 sps:$4 sm:$0xff]  }
 0x202   :  { %v4184_v24 = vpop.f32.mrf.mxu0  ;;  %4441 = vmatmul.mubr.bf16.vlgmr.msra.gmra.mxu0 %v7355_v11  ;;  %v6083_v11 = vld [vmem:[%s8409_s1 + $0x64c] ss:$148 sps:$4 sm:$0xff]   ;;  %4482 = vmatpush2.bf16.msra.mxu1 %v6102_v37 }
 0x203   :  { %v4185_v27 = vadd.f32 %v4184_v24, %v702_v21  ;;  %4495 = vmatpush1.bf16.msra.mxu0 %v6069_v22  ;;  %4526 = vmatprep.mubr.bf16.mxu0 %v8010_v32  ;;  %v6122_v22 = vld [vmem:[%s8409_s1 + $0x10b4] ss:$148 sps:$4 sm:$0xff]   ;;  %v6128_v24 = vld [vmem:[%s8409_s1 + $0xf8c] ss:$148 sps:$4 sm:$0xff]  }
 0x204   :  { %v4186_v31 = vpop.f32.mrf.mxu0  ;;  %4496 = vmatprep.subr.bf16.mxu0 %v6077_v23  ;;  %4537 = vmatprep.subr.bf16.mxu1 %v6113_v40  ;;  %v6120_v23 = vld [vmem:[%s8409_s1 + $0x10b0] ss:$148 sps:$4 sm:$0xff]   ;;  %v6162_v37 = vld [vmem:[%s8409_s1 + $0x10b8] ss:$148 sps:$4 sm:$0xff]   ;;  %v6146_v40 = vld [vmem:[%s8409_s1 + $0xc14] ss:$148 sps:$4 sm:$0xff]  }
 0x205   :  { %4637 = vst [vmem:[%s8412_s3 + $0x80] sm:$0xff] %v4185_v27  ;;  %v4187_v33 = vadd.f32 %v4186_v31, %v706_v52  ;;  %v4227_v50 = vpop.f32.mrf.mxu1  ;;  %4484 = vmatmul.mubr.bf16.vlgmr.msra.gmra.mxu1 %v8056_v51  ;;  %v6126_v27 = vld [vmem:[%s8409_s1 + $0xf88] ss:$148 sps:$4 sm:$0xff]   ;;  %v6159_v31 = vld [vmem:[%s8409_s1 + $0x11e0] ss:$148 sps:$4 sm:$0xff]  }
 0x206   :  { %v4188_v35 = vpop.f32.mrf.mxu0  ;;  %v4228_v17 = vadd.f32 %v4227_v50, %v710_v8  ;;  %4538 = vmatpush1.bf16.msra.mxu1 %v6111_v45  ;;  %4569 = vmatprep.mubr.bf16.mxu1 %v8010_v32  ;;  %v6152_v45 = vld [vmem:[%s8409_s1 + $0xaec] ss:$148 sps:$4 sm:$0xff]  }
 0x207   :  { %4638 = vst [vmem:[%s8412_s3 + $0x88] sm:$0xff] %v4187_v33  ;;  %v4189_v38 = vadd.f32 %v4188_v35, %v702_v21  ;;  %4497 = vmatpush1.bf16.msra.mxu0 %v6075_v28  ;;  %v4229_v55 = vpop.f32.mrf.mxu1  ;;  %4539 = vmatprep.subr.bf16.mxu1 %v6119_v47  ;;  %v6149_v21 = vld [vmem:[%s8409_s1 + $0x1b4] ss:$148 sps:$4 sm:$0xff]   ;;  %v6161_v28 = vld [vmem:[%s8409_s1 + $0x11e4] ss:$148 sps:$4 sm:$0xff]  }
 0x208   :  { %v4190_v42 = vpop.f32.mrf.mxu0  ;;  %4498 = vmatprep.subr.bf16.mxu0 %v6083_v11  ;;  %4639 = vst [vmem:[%s8412_s3 + $0x90] sm:$0xff] %v4228_v17  ;;  %v4230_v59 = vadd.f32 %v4229_v55, %v714_v49  ;;  %v6132_v11 = vld [vmem:[%s8409_s1 + $0xe60] ss:$148 sps:$4 sm:$0xff]   ;;  %v6164_v33 = vld [vmem:[%s8409_s1 + $0x10bc] ss:$148 sps:$4 sm:$0xff]   ;;  %v718_v55 = vrot.slane %v7973_v19, %v7257_v36 }
 0x209   :  { %4675 = vst [vmem:[%s8412_s3 + $0x1a8] sm:$0xff] %v4189_v38  ;;  %v4191_v44 = vadd.f32 %v4190_v42, %v706_v52  ;;  %v4231_v60 = vpop.f32.mrf.mxu1  ;;  %v6155_v52 = vld [vmem:[%s8409_s1 + $0x8c] ss:$148 sps:$4 sm:$0xff]   ;;  %v6140_v35 = vld [vmem:[%s8409_s1 + $0xd3c] ss:$148 sps:$4 sm:$0xff]  }
 0x20a   :  { %4640 = vst [vmem:[%s8412_s3 + $0x98] sm:$0xff] %v4230_v59  ;;  %v4232_v0 = vadd.f32 %v4231_v60, %v710_v8  ;;  %4540 = vmatpush1.bf16.msra.mxu1 %v6117_v53  ;;  %v6138_v38 = vld [vmem:[%s8409_s1 + $0xd38] ss:$148 sps:$4 sm:$0xff]   ;;  %v6167_v42 = vld [vmem:[%s8409_s1 + $0xf90] ss:$148 sps:$4 sm:$0xff]   ;;  %v722_v60 = vrot.slane %v7973_v19, %v7272_v41 }
 0x20b   :  { %4676 = vst [vmem:[%s8412_s3 + $0x1b0] sm:$0xff] %v4191_v44  ;;  %4499 = vmatpush1.bf16.msra.mxu0 %v6081_v39  ;;  %v4233_v62 = vpop.f32.mrf.mxu1  ;;  %4541 = vmatprep.subr.bf16.mxu1 %v6125_v56  ;;  %v6169_v39 = vld [vmem:[%s8409_s1 + $0xf94] ss:$148 sps:$4 sm:$0xff]   ;;  %v6174_v44 = vld [vmem:[%s8409_s1 + $0xe6c] ss:$148 sps:$4 sm:$0xff]  }
 0x20c   :  { %4500 = vmatprep.subr.bf16.mxu0 %v6089_v43  ;;  %4677 = vst [vmem:[%s8412_s3 + $0x1b8] sm:$0xff] %v4232_v0  ;;  %v4234_v7 = vadd.f32 %v4233_v62, %v714_v49  ;;  %v6144_v43 = vld [vmem:[%s8409_s1 + $0xc10] ss:$148 sps:$4 sm:$0xff]   ;;  %v6172_v8 = vld [vmem:[%s8409_s1 + $0xe68] ss:$148 sps:$4 sm:$0xff]  }
 0x20d   :  { %v6179_v47 = vld [vmem:[%s8409_s1 + $0xd44] ss:$148 sps:$4 sm:$0xff]   ;;  %v6177_v49 = vld [vmem:[%s8409_s1 + $0xd40] ss:$148 sps:$4 sm:$0xff]   ;;  %v6184_v17 = vld [vmem:[%s8409_s1 + $0xc1c] ss:$148 sps:$4 sm:$0xff]  }
 0x20e   :  { %4678 = vst [vmem:[%s8412_s3 + $0x1c0] sm:$0xff] %v4234_v7  ;;  %4542 = vmatpush1.bf16.msra.mxu1 %v6123_v1  ;;  %v6156_v50 = vld [vmem:[%s8409_s1 + $0x9c0] ss:$148 sps:$4 sm:$0xff]   ;;  %v6165_v53 = vld [vmem:[%s8409_s1 + $0x11e8] ss:$148 sps:$4 sm:$0xff]  }
 0x20f   :  { %4501 = vmatpush1.bf16.msra.mxu0 %v6087_v46  ;;  %4543 = vmatprep.subr.bf16.mxu1 %v6131_v5  ;;  %v6150_v46 = vld [vmem:[%s8409_s1 + $0xae8] ss:$148 sps:$4 sm:$0xff]   ;;  %v6170_v59 = vld [vmem:[%s8409_s1 + $0x10c0] ss:$148 sps:$4 sm:$0xff]   ;;  %v6187_v1 = vld [vmem:[%s8409_s1 + $0xaf0] ss:$148 sps:$4 sm:$0xff]  }
 0x210   :  { %4502 = vmatprep.subr.bf16.mxu0 %v6095_v48  ;;  %v6158_v48 = vld [vmem:[%s8409_s1 + $0x9c4] ss:$148 sps:$4 sm:$0xff]   ;;  %v6166_v56 = vld [vmem:[%s8409_s1 + $0x8a8] ss:$148 sps:$4 sm:$0xff]   ;;  %v6171_v62 = vld [vmem:[%s8409_s1 + $0x780] ss:$148 sps:$4 sm:$0xff]  }
 0x211   :  { %v6194_v5 = vld [vmem:[%s8409_s1 + $0x9cc] ss:$148 sps:$4 sm:$0xff]  }
 0x212   :  { %4544 = vmatpush1.bf16.msra.mxu1 %v6129_v61  ;;  %v6175_v7 = vld [vmem:[%s8409_s1 + $0xf98] ss:$148 sps:$4 sm:$0xff]  }
 0x213   :  { %4503 = vmatpush1.bf16.msra.mxu0 %v6093_v54  ;;  %4545 = vmatprep.subr.bf16.mxu1 %v6137_v3  ;;  %v6182_v54 = vld [vmem:[%s8409_s1 + $0xc18] ss:$148 sps:$4 sm:$0xff]   ;;  %v6192_v3 = vld [vmem:[%s8409_s1 + $0x9c8] ss:$148 sps:$4 sm:$0xff]  }
 0x214   :  { %4504 = vmatprep.subr.bf16.mxu0 %v6101_v58  ;;  %v6189_v58 = vld [vmem:[%s8409_s1 + $0xaf4] ss:$148 sps:$4 sm:$0xff]  }
 0x216   :  { %4546 = vmatpush1.bf16.msra.mxu1 %v6135_v14 }
 0x217   :  { %4505 = vmatpush1.bf16.msra.mxu0 %v6099_v2  ;;  %4547 = vmatprep.subr.bf16.mxu1 %v6143_v16 }
 0x218   :  { %4506 = vmatprep.subr.bf16.mxu0 %v6107_v6 }
 0x21a   :  { %4548 = vmatpush1.bf16.msra.mxu1 %v6141_v34  ;;  %v6181_v34 = vld [vmem:[%s8409_s1 + $0x530] ss:$148 sps:$4 sm:$0xff]  }
 0x21b   :  { %4507 = vmatpush1.bf16.msra.mxu0 %v6105_v12  ;;  %4549 = vmatprep.subr.bf16.mxu1 %v6149_v21  ;;  %v730_v21 = vrot.slane %v7973_v19, %v7325_v63 }
 0x21c   :  { %4508 = vmatprep.subr.bf16.mxu0 %v6110_v13 }
 0x21e   :  { %4550 = vmatpush1.bf16.msra.mxu1 %v6147_v10 }
 0x21f   :  { %4509 = vmatpush1.bf16.msra.mxu0 %v6108_v15  ;;  %4551 = vmatprep.subr.bf16.mxu1 %v6155_v52  ;;  %v6180_v15 = vld [vmem:[%s8409_s1 + $0xe70] ss:$148 sps:$4 sm:$0xff]  }
 0x220   :  { %4510 = vmatprep.subr.bf16.mxu0 %v6116_v18  ;;  %v726_v18 = vrot.slane %v7973_v19, %v7316_v57 }
 0x222   :  { %4552 = vmatpush1.bf16.msra.mxu1 %v6153_v25 }
 0x223   :  { %4511 = vmatpush2.bf16.msra.mxu0 %v6114_v20  ;;  %4553 = vmatprep.subr.bf16.mxu1 %v6161_v28  ;;  %v6185_v20 = vld [vmem:[%s8409_s1 + $0xd48] ss:$148 sps:$4 sm:$0xff]   ;;  %v6191_v28 = vld [vmem:[%s8409_s1 + $0x2e0] ss:$148 sps:$4 sm:$0xff]  }
 0x224   :  { %4512 = vmatprep.subr.bf16.mxu0 %v6122_v22 }
 0x226   :  { %4554 = vmatpush2.bf16.msra.mxu1 %v6159_v31  ;;  %v6195_v31 = vld [vmem:[%s8409_s1 + $0xaf8] ss:$148 sps:$4 sm:$0xff]  }
 0x227   :  { %4513 = vmatpush2.bf16.msra.mxu0 %v6120_v23  ;;  %4555 = vmatprep.subr.bf16.mxu1 %v6164_v33  ;;  %v6186_v23 = vld [vmem:[%s8409_s1 + $0x408] ss:$148 sps:$4 sm:$0xff]   ;;  %v6196_v33 = vld [vmem:[%s8409_s1 + $0x1b8] ss:$148 sps:$4 sm:$0xff]  }
 0x228   :  { %4514 = vmatprep.subr.bf16.mxu0 %v6128_v24  ;;  %v6190_v24 = vld [vmem:[%s8409_s1 + $0xc20] ss:$148 sps:$4 sm:$0xff]  }
 0x22a   :  { %4556 = vmatpush2.bf16.msra.mxu1 %v6162_v37  ;;  %v6198_v37 = vld [vmem:[%s8409_s1 + $0x90] ss:$148 sps:$4 sm:$0xff]  }
 0x22b   :  { %4515 = vmatpush2.bf16.msra.mxu0 %v6126_v27  ;;  %4557 = vmatprep.subr.bf16.mxu1 %v6169_v39 }
 0x22c   :  { %4516 = vmatprep.subr.bf16.mxu0 %v6134_v29 }
 0x22e   :  { %4558 = vmatpush2.bf16.msra.mxu1 %v6167_v42 }
 0x22f   :  { %4517 = vmatpush2.bf16.msra.mxu0 %v6132_v11  ;;  %4559 = vmatprep.subr.bf16.mxu1 %v6174_v44 }
 0x230   :  { %4518 = vmatprep.subr.bf16.mxu0 %v6140_v35  ;;  %v6197_v35 = vld [vmem:[%s8409_s1 + $0x9d0] ss:$148 sps:$4 sm:$0xff]  }
 0x232   :  { %4560 = vmatpush2.bf16.msra.mxu1 %v6172_v8 }
 0x233   :  { %4519 = vmatpush2.bf16.msra.mxu0 %v6138_v38  ;;  %4561 = vmatprep.subr.bf16.mxu1 %v6179_v47  ;;  %v628_v38 = vld [vmem:[%s8411_s2 + $0x18] sm:$0xff] }
 0x234   :  { %4520 = vmatprep.subr.bf16.mxu0 %v6146_v40  ;;  %v734_v39 = vrot.slane %v628_v38, %v7017_v4  ;;  %v738_v40 = vrot.slane %v628_v38, %v7032_v9 }
 0x236   :  { %4562 = vmatpush2.bf16.msra.mxu1 %v6177_v49  ;;  %v746_v49 = vrot.slane %v628_v38, %v7080_v30 }
 0x237   :  { %4521 = vmatpush2.bf16.msra.mxu0 %v6144_v43  ;;  %4563 = vmatprep.subr.bf16.mxu1 %v6184_v17 }
 0x238   :  { %4522 = vmatprep.subr.bf16.mxu0 %v6152_v45 }
 0x23a   :  { %4564 = vmatpush2.bf16.msra.mxu1 %v6182_v54 }
 0x23b   :  { %4523 = vmatpush2.bf16.msra.mxu0 %v6150_v46  ;;  %4565 = vmatprep.subr.bf16.mxu1 %v6189_v58 }
 0x23c   :  { %4524 = vmatprep.subr.bf16.mxu0 %v6158_v48  ;;  %v742_v48 = vrot.slane %v628_v38, %v7071_v26 }
 0x23e   :  { %4566 = vmatpush2.bf16.msra.mxu1 %v6187_v1 }
 0x23f   :  { %4525 = vmatpush2.bf16.msra.mxu0 %v6156_v50  ;;  %4567 = vmatprep.subr.bf16.mxu1 %v6194_v5 }
 0x240   :  { %5294 = vmatprep.subr.bf16.mxu0 %v6165_v53 }
 0x242   :  { %v4270_v0 = vpop.f32.mrf.mxu0  ;;  %4527 = vmatmul.mubr.bf16.vlgmr.msra.gmra.mxu0 %v8056_v51  ;;  %4568 = vmatpush2.bf16.msra.mxu1 %v6192_v3  ;;  %v762_v3 = vrot.slane %v628_v38, %v7325_v63 }
 0x243   :  { %v4271_v2 = vadd.f32 %v4270_v0, %v718_v55  ;;  %5295 = vmatpush3.bf16.msra.mxu0 %v6166_v56  ;;  %4612 = vmatprep.mubr.bf16.mxu0 %v8010_v32  ;;  %v6176_v32 = vld [vmem:[%s8409_s1 + $0x658] ss:$148 sps:$4 sm:$0xff]   ;;  %v754_v0 = vrot.slane %v628_v38, %v7272_v41 }
 0x244   :  { %v4272_v6 = vpop.f32.mrf.mxu0  ;;  %5296 = vmatprep.subr.bf16.mxu0 %v6170_v59 }
 0x245   :  { %4641 = vst [vmem:[%s8412_s3 + $0xa0] sm:$0xff] %v4271_v2  ;;  %v4273_v61 = vadd.f32 %v4272_v6, %v722_v60  ;;  %4570 = vmatmul.mubr.bf16.vlgmr.msra.gmra.mxu1 %v8056_v51  ;;  %v4313_v22 = vpop.f32.mrf.mxu1 }
 0x246   :  { %v4274_v12 = vpop.f32.mrf.mxu0  ;;  %v4314_v10 = vadd.f32 %v4313_v22, %v726_v18 }
 0x247   :  { %4642 = vst [vmem:[%s8412_s3 + $0xa8] sm:$0xff] %v4273_v61  ;;  %v4275_v13 = vadd.f32 %v4274_v12, %v718_v55  ;;  %5297 = vmatpush3.bf16.msra.mxu0 %v6171_v62  ;;  %v4315_v52 = vpop.f32.mrf.mxu1  ;;  %v758_v12 = vrot.slane %v628_v38, %v7316_v57 }
 0x248   :  { %v4276_v14 = vpop.f32.mrf.mxu0  ;;  %5298 = vmatprep.subr.bf16.mxu0 %v6175_v7  ;;  %4643 = vst [vmem:[%s8412_s3 + $0xb0] sm:$0xff] %v4314_v10  ;;  %v4316_v19 = vadd.f32 %v4315_v52, %v730_v21 }
 0x249   :  { %4679 = vst [vmem:[%s8412_s3 + $0x1c8] sm:$0xff] %v4275_v13  ;;  %v4277_v16 = vadd.f32 %v4276_v14, %v722_v60  ;;  %v4317_v25 = vpop.f32.mrf.mxu1  ;;  %v750_v60 = vrot.slane %v628_v38, %v7257_v36 }
 0x24a   :  { %4644 = vst [vmem:[%s8412_s3 + $0xb8] sm:$0xff] %v4316_v19  ;;  %v4318_v27 = vadd.f32 %v4317_v25, %v726_v18 }
 0x24b   :  { %4680 = vst [vmem:[%s8412_s3 + $0x1d0] sm:$0xff] %v4277_v16  ;;  %5299 = vmatpush3.bf16.msra.mxu0 %v6176_v32  ;;  %v4319_v29 = vpop.f32.mrf.mxu1 }
 0x24c   :  { %5300 = vmatprep.subr.bf16.mxu0 %v6180_v15  ;;  %4681 = vst [vmem:[%s8412_s3 + $0x1d8] sm:$0xff] %v4318_v27  ;;  %v4320_v11 = vadd.f32 %v4319_v29, %v730_v21 }
 0x24e   :  { %4682 = vst [vmem:[%s8412_s3 + $0x1e0] sm:$0xff] %v4320_v11 }
 0x24f   :  { %5301 = vmatpush3.bf16.msra.mxu0 %v6181_v34  ;;  %v629_v34 = vld [vmem:[%s8411_s2 + $0x20] sm:$0x1f] }
 0x250   :  { %5302 = vmatprep.subr.bf16.mxu0 %v6185_v20  ;;  %v766_v20 = vrot.slane %v629_v34, %v7017_v4  ;;  %v770_v21 = vrot.slane %v629_v34, %v7032_v9  ;;  %v774_v9 = vrot.slane %v629_v34, %v7071_v26  ;;  %v778_v27 = vrot.slane %v629_v34, %v7080_v30 }
 0x251   :  { %v782_v38 = vrot.slane %v629_v34, %v7257_v36 }
 0x253   :  { %5303 = vmatpush3.bf16.msra.mxu0 %v6186_v23 }
 0x254   :  { %5304 = vmatprep.subr.bf16.mxu0 %v6190_v24 }
 0x257   :  { %5305 = vmatpush3.bf16.msra.mxu0 %v6191_v28 }
 0x258   :  { %5306 = vmatprep.subr.bf16.mxu0 %v6195_v31 }
 0x25b   :  { %5307 = vmatpush3.bf16.msra.mxu0 %v6196_v33 }
 0x25c   :  { %5308 = vmatprep.subr.bf16.mxu0 %v6197_v35 }
 0x25f   :  { %5309 = vmatpush3.bf16.msra.mxu0 %v6198_v37 }
 0x262   :  { %4613 = vmatmul.mubr.bf16.vlgmr.msra.gmra.mxu0 %v8056_v51 }
 0x282   :  { %v4356_v42 = vpop.f32.mrf.mxu0 }
 0x283   :  { %v4357_v43 = vadd.f32 %v4356_v42, %v734_v39 }
 0x284   :  { %v4358_v44 = vpop.f32.mrf.mxu0 }
 0x285   :  { %4645 = vst [vmem:[%s8412_s3 + $0xc0] sm:$0xff] %v4357_v43  ;;  %v4359_v45 = vadd.f32 %v4358_v44, %v738_v40  ;;  %v4399_v50 = vpop.f32.mrf.mxu1 }
 0x286   :  { %v4360_v8 = vpop.f32.mrf.mxu0  ;;  %v4400_v17 = vadd.f32 %v4399_v50, %v742_v48 }
 0x287   :  { %4646 = vst [vmem:[%s8412_s3 + $0xc8] sm:$0xff] %v4359_v45  ;;  %v4361_v51 = vadd.f32 %v4360_v8, %v734_v39  ;;  %v4401_v53 = vpop.f32.mrf.mxu1 }
 0x288   :  { %v4362_v46 = vpop.f32.mrf.mxu0  ;;  %4647 = vst [vmem:[%s8412_s3 + $0xd0] sm:$0xff] %v4400_v17  ;;  %v4402_v54 = vadd.f32 %v4401_v53, %v746_v49 }
 0x289   :  { %4683 = vst [vmem:[%s8412_s3 + $0x1e8] sm:$0xff] %v4361_v51  ;;  %v4363_v47 = vadd.f32 %v4362_v46, %v738_v40  ;;  %v4403_v55 = vpop.f32.mrf.mxu1 }
 0x28a   :  { %4648 = vst [vmem:[%s8412_s3 + $0xd8] sm:$0xff] %v4402_v54  ;;  %v4404_v56 = vadd.f32 %v4403_v55, %v742_v48 }
 0x28b   :  { %4684 = vst [vmem:[%s8412_s3 + $0x1f0] sm:$0xff] %v4363_v47  ;;  %v4405_v58 = vpop.f32.mrf.mxu1 }
 0x28c   :  { %4685 = vst [vmem:[%s8412_s3 + $0x1f8] sm:$0xff] %v4404_v56  ;;  %v4406_v59 = vadd.f32 %v4405_v58, %v746_v49 }
 0x28e   :  { %4686 = vst [vmem:[%s8412_s3 + $0x200] sm:$0xff] %v4406_v59 }
 0x2c2   :  { %v4442_v1 = vpop.f32.mrf.mxu0 }
 0x2c3   :  { %v4443_v2 = vadd.f32 %v4442_v1, %v750_v60 }
 0x2c4   :  { %v4444_v62 = vpop.f32.mrf.mxu0 }
 0x2c5   :  { %4649 = vst [vmem:[%s8412_s3 + $0xe0] sm:$0xff] %v4443_v2  ;;  %v4445_v5 = vadd.f32 %v4444_v62, %v754_v0  ;;  %v4485_v13 = vpop.f32.mrf.mxu1 }
 0x2c6   :  { %v4446_v6 = vpop.f32.mrf.mxu0  ;;  %v4486_v32 = vadd.f32 %v4485_v13, %v758_v12 }
 0x2c7   :  { %4650 = vst [vmem:[%s8412_s3 + $0xe8] sm:$0xff] %v4445_v5  ;;  %v4447_v7 = vadd.f32 %v4446_v6, %v750_v60  ;;  %v4487_v14 = vpop.f32.mrf.mxu1 }
 0x2c8   :  { %v4448_v61 = vpop.f32.mrf.mxu0  ;;  %4651 = vst [vmem:[%s8412_s3 + $0xf0] sm:$0xff] %v4486_v32  ;;  %v4488_v15 = vadd.f32 %v4487_v14, %v762_v3 }
 0x2c9   :  { %4687 = vst [vmem:[%s8412_s3 + $0x208] sm:$0xff] %v4447_v7  ;;  %v4449_v41 = vadd.f32 %v4448_v61, %v754_v0  ;;  %v4489_v16 = vpop.f32.mrf.mxu1 }
 0x2ca   :  { %4652 = vst [vmem:[%s8412_s3 + $0xf8] sm:$0xff] %v4488_v15  ;;  %v4490_v57 = vadd.f32 %v4489_v16, %v758_v12 }
 0x2cb   :  { %4688 = vst [vmem:[%s8412_s3 + $0x210] sm:$0xff] %v4449_v41  ;;  %v4491_v18 = vpop.f32.mrf.mxu1 }
 0x2cc   :  { %4689 = vst [vmem:[%s8412_s3 + $0x218] sm:$0xff] %v4490_v57  ;;  %v4492_v63 = vadd.f32 %v4491_v18, %v762_v3 }
 0x2ce   :  { %4690 = vst [vmem:[%s8412_s3 + $0x220] sm:$0xff] %v4492_v63 }
 0x302   :  { %v4528_v22 = vpop.f32.mrf.mxu0 }
 0x303   :  { %v4529_v10 = vadd.f32 %v4528_v22, %v766_v20 }
 0x304   :  { %v4530_v23 = vpop.f32.mrf.mxu0 }
 0x305   :  { %4653 = vst [vmem:[%s8412_s3 + $0x100] sm:$0xff] %v4529_v10  ;;  %v4531_v52 = vadd.f32 %v4530_v23, %v770_v21  ;;  %v4571_v28 = vpop.f32.mrf.mxu1 }
 0x306   :  { %v4532_v24 = vpop.f32.mrf.mxu0  ;;  %v4572_v29 = vadd.f32 %v4571_v28, %v774_v9 }
 0x307   :  { %4654 = vst [vmem:[%s8412_s3 + $0x108] sm:$0xff] %v4531_v52  ;;  %v4533_v19 = vadd.f32 %v4532_v24, %v766_v20  ;;  %v4573_v31 = vpop.f32.mrf.mxu1 }
 0x308   :  { %v4534_v25 = vpop.f32.mrf.mxu0  ;;  %4655 = vst [vmem:[%s8412_s3 + $0x110] sm:$0xff] %v4572_v29  ;;  %v4574_v11 = vadd.f32 %v4573_v31, %v778_v27 }
 0x309   :  { %4691 = vst [vmem:[%s8412_s3 + $0x228] sm:$0xff] %v4533_v19  ;;  %v4535_v4 = vadd.f32 %v4534_v25, %v770_v21  ;;  %v4575_v33 = vpop.f32.mrf.mxu1 }
 0x30a   :  { %4656 = vst [vmem:[%s8412_s3 + $0x118] sm:$0xff] %v4574_v11  ;;  %v4576_v26 = vadd.f32 %v4575_v33, %v774_v9 }
 0x30b   :  { %4692 = vst [vmem:[%s8412_s3 + $0x230] sm:$0xff] %v4535_v4  ;;  %v4577_v35 = vpop.f32.mrf.mxu1 }
 0x30c   :  { %4693 = vst [vmem:[%s8412_s3 + $0x238] sm:$0xff] %v4576_v26  ;;  %v4578_v30 = vadd.f32 %v4577_v35, %v778_v27 }
 0x30e   :  { %4694 = vst [vmem:[%s8412_s3 + $0x240] sm:$0xff] %v4578_v30 }
 0x322   :  { %v5310_v37 = vpop.f32.mrf.mxu0 }
 0x324   :  { %v5311_v39 = vpop.f32.mrf.mxu0 }
 0x325   :  { %v5312_v40 = vadd.f32 %v5311_v39, %v5310_v37 }
 0x326   :  { %v5313_v42 = vpop.f32.mrf.mxu0 }
 0x327   :  { %v4615_v43 = vadd.f32 %v5312_v40, %v782_v38 }
 0x328   :  { %v5314_v44 = vpop.f32.mrf.mxu0 }
 0x329   :  { %4658 = vst.msk [vmem:[%s8412_s3 + $0x120] sm:$0xff] %vm4657_vm0, %v4615_v43  ;;  %v5315_v45 = vadd.f32 %v5314_v44, %v5313_v42 }
 0x32b   :  { %v4618_v8 = vadd.f32 %v5315_v45, %v782_v38 }
 0x32d   :  { %4695 = vst.msk [vmem:[%s8412_s3 + $0x248] sm:$0xff] %vm4657_vm0, %v4618_v8 }

</bundles_post_ra>
